<compile_context>
chip_gen: v5e
topology: v5e:2x2
jax: 0.10.0
libtpu: 0.0.40
codegen_flags: <defaults>
</compile_context>

<pallas_src>
import functools

import jax
import jax.numpy as jnp
from jax.experimental import pallas as pl
from jax.experimental.pallas import tpu as pltpu


def _features_linear_kernel(
    feat_ids_ref,   # SMEM (B_pad * max_F,) int32, padded (zero-row index) feature ids
    rate_ids_ref,   # SMEM (B_pad * max_F,) int32, rating bucket ids in [0, 9]
    item_ids_ref,   # SMEM (B_pad,)         int32
    user_tab_ref,   # VMEM (num_items + 2, D_pad) f32   (last row all zeros)
    rate_tab_ref,   # VMEM (10, D_pad)            f32
    item_tab_ref,   # VMEM (num_items, D_pad)     f32
    bias_ref,       # VMEM (1, D_pad)             f32
    out_ref,        # VMEM (TB, D_pad)            f32   (one batch tile)
    *, tb, max_f,
):
    d_pad = out_ref.shape[1]
    base = pl.program_id(0) * tb            # first batch row of this tile

    bias = bias_ref[...]                     # hoisted: loaded once per tile

    rows = []
    for b in range(tb):                      # static unroll over the batch tile
        gb = base + b
        off = gb * max_f
        acc = jnp.zeros((1, d_pad), jnp.float32)
        for f in range(max_f):               # static unroll over padded features
            fid = feat_ids_ref[off + f]
            rid = rate_ids_ref[off + f]
            # padded slots index the all-zeros user row -> contribute exactly 0
            acc = acc + user_tab_ref[pl.ds(fid, 1), :] * rate_tab_ref[pl.ds(rid, 1), :]
        iid = item_ids_ref[gb]
        rows.append(acc + item_tab_ref[pl.ds(iid, 1), :])

    # single full-tile (TB, D_pad) store instead of TB masked per-row stores
    out_ref[...] = jnp.concatenate(rows, axis=0) + bias


@functools.partial(jax.jit, static_argnames=("tb", "max_f"))
def features_linear_pallas(feat_flat, rate_flat, item_ids,
                           user_tab, rate_tab, item_tab, bias2d, *, tb, max_f):
    b_pad = item_ids.shape[0]
    d_pad = user_tab.shape[1]
    kernel = functools.partial(_features_linear_kernel, tb=tb, max_f=max_f)
    return pl.pallas_call(
        kernel,
        out_shape=jax.ShapeDtypeStruct((b_pad, d_pad), jnp.float32),
        grid=(b_pad // tb,),
        in_specs=[
            pl.BlockSpec(memory_space=pltpu.MemorySpace.SMEM),  # feat ids (flat)
            pl.BlockSpec(memory_space=pltpu.MemorySpace.SMEM),  # rate ids (flat)
            pl.BlockSpec(memory_space=pltpu.MemorySpace.SMEM),  # item ids
            pl.BlockSpec(memory_space=pltpu.MemorySpace.VMEM),  # user table (resident)
            pl.BlockSpec(memory_space=pltpu.MemorySpace.VMEM),  # rating table
            pl.BlockSpec(memory_space=pltpu.MemorySpace.VMEM),  # item table
            pl.BlockSpec(memory_space=pltpu.MemorySpace.VMEM),  # bias (1, D_pad)
        ],
        out_specs=pl.BlockSpec((tb, d_pad), lambda i: (i, 0)),
        compiler_params=pltpu.CompilerParams(
            dimension_semantics=("parallel",),        # batch tiles independent (2 TCs on v7x)
            vmem_limit_bytes=48 * 1024 * 1024,        # keep tables resident without spill
        ),
    )(feat_flat, rate_flat, item_ids, user_tab, rate_tab, item_tab, bias2d)


def features_linear(feature_ids_list, feature_ratings_list, item_ids,
                    user_tab, rate_tab, item_tab, bias, *, tb=8, lane=128):
    """Glue: pad ragged lists / lane dim / batch dim and call the kernel."""
    B = len(feature_ids_list)
    D = user_tab.shape[1]
    num_items = item_tab.shape[0]
    zero_row = num_items + 1                  # index of appended all-zeros user row

    lens = [int(jnp.asarray(x).shape[0]) for x in feature_ids_list]
    max_f = max(max(lens), 1)
    b_pad = ((B + tb - 1) // tb) * tb
    d_pad = ((D + lane - 1) // lane) * lane

    def pad_ids(x, fill):
        x = jnp.asarray(x, jnp.int32)
        return jnp.pad(x, (0, max_f - x.shape[0]), constant_values=fill)

    feat_ids = jnp.stack([pad_ids(x, zero_row) for x in feature_ids_list])
    # integer rating bucket: round(r*2) - 1  (== int((r-0.5)*2) for exact fp ratings)
    rate_ids = jnp.stack([
        pad_ids(jnp.round(jnp.asarray(r, jnp.float32) * 2.0).astype(jnp.int32) - 1, 0)
        for r in feature_ratings_list
    ])
    item_ids = jnp.asarray(item_ids, jnp.int32)

    if b_pad > B:
        feat_ids = jnp.concatenate(
            [feat_ids, jnp.full((b_pad - B, max_f), zero_row, jnp.int32)], axis=0)
        rate_ids = jnp.concatenate(
            [rate_ids, jnp.zeros((b_pad - B, max_f), jnp.int32)], axis=0)
        item_ids = jnp.concatenate(
            [item_ids, jnp.zeros((b_pad - B,), jnp.int32)], axis=0)

    feat_flat = feat_ids.reshape(-1)          # 1-D SMEM (avoids 2-D SMEM padding)
    rate_flat = rate_ids.reshape(-1)

    def pad_lane(t):
        t = jnp.asarray(t, jnp.float32)
        return jnp.pad(t, ((0, 0), (0, d_pad - t.shape[1])))

    user_p = pad_lane(jnp.concatenate(
        [jnp.asarray(user_tab, jnp.float32),
         jnp.zeros((1, D), jnp.float32)], axis=0))          # + all-zeros pad row
    rate_p = pad_lane(rate_tab)
    item_p = pad_lane(item_tab)
    bias_p = pad_lane(jnp.asarray(bias, jnp.float32).reshape(1, -1))

    out = features_linear_pallas(feat_flat, rate_flat, item_ids,
                                 user_p, rate_p, item_p, bias_p,
                                 tb=tb, max_f=max_f)
    return out[:B, :D]


def features_linear_ref(feature_ids_list, feature_ratings_list, item_ids,
                        user_tab, rate_tab, item_tab, bias):
    """Pure-JAX reference mirroring the PyTorch forward."""
    rows = []
    for ids, rs in zip(feature_ids_list, feature_ratings_list):
        ids = jnp.asarray(ids, jnp.int32)
        ridx = ((jnp.asarray(rs, jnp.float32) - 0.5) * 2.0).astype(jnp.int32)
        rows.append(jnp.sum(user_tab[ids] * rate_tab[ridx], axis=0))
    user_w = jnp.stack(rows)
    return user_w + item_tab[jnp.asarray(item_ids, jnp.int32)] + bias


if __name__ == "__main__":
    num_items = 20
    output_dim = 32
    batch = 2

    key = jax.random.PRNGKey(0)
    k_user, k_rate, k_item, k_ids, k_rs, k_items = jax.random.split(key, 6)

    # nn.Embedding default init is N(0, 1); bias is zeros.
    user_tab = jax.random.normal(k_user, (num_items + 1, output_dim), jnp.float32)
    rate_tab = jax.random.normal(k_rate, (10, output_dim), jnp.float32)
    item_tab = jax.random.normal(k_item, (num_items, output_dim), jnp.float32)
    bias = jnp.zeros((output_dim,), jnp.float32)

    # Ragged per-user histories (lists of different lengths), ratings in {0.5,...,5.0}.
    lens = [3, 5]
    all_ids = jax.random.randint(k_ids, (sum(lens),), 0, num_items + 1, jnp.int32)
    all_rates = (jax.random.randint(k_rs, (sum(lens),), 1, 11, jnp.int32)
                 .astype(jnp.float32) * 0.5)
    feature_ids_list, feature_ratings_list, off = [], [], 0
    for n in lens:
        feature_ids_list.append(all_ids[off:off + n])
        feature_ratings_list.append(all_rates[off:off + n])
        off += n
    item_ids = jax.random.randint(k_items, (batch,), 0, num_items, jnp.int32)

    out = features_linear(feature_ids_list, feature_ratings_list, item_ids,
                          user_tab, rate_tab, item_tab, bias)
    out = jax.block_until_ready(out)

    ref = features_linear_ref(feature_ids_list, feature_ratings_list, item_ids,
                              user_tab, rate_tab, item_tab, bias)
    assert out.shape == (batch, output_dim)
    assert jnp.allclose(out, ref, atol=1e-5, rtol=1e-5), "mismatch vs reference"

    print("KERNEL_OK")
</pallas_src>

<mosaic_0001>
module attributes {stable_mosaic.version = 11 : i64} {
  func.func @_features_linear_kernel(%arg0: i32, %arg1: memref<40xi32, #tpu.memory_space<smem>>, %arg2: memref<40xi32, #tpu.memory_space<smem>>, %arg3: memref<8xi32, #tpu.memory_space<smem>>, %arg4: memref<22x128xf32, #tpu.memory_space<vmem>>, %arg5: memref<10x128xf32, #tpu.memory_space<vmem>>, %arg6: memref<20x128xf32, #tpu.memory_space<vmem>>, %arg7: memref<1x128xf32, #tpu.memory_space<vmem>>, %arg8: memref<8x128xf32, #tpu.memory_space<vmem>>) attributes {dimension_semantics = [#tpu.dimension_semantics<parallel>], iteration_bounds = array<i64: 1>, scalar_prefetch = 0 : i64, scratch_operands = 0 : i64, tpu.core_type = #tpu.core_type<tc>, window_params = [{transform_indices = @transform_0, window_bounds = array<i64: 40>}, {transform_indices = @transform_1, window_bounds = array<i64: 40>}, {transform_indices = @transform_2, window_bounds = array<i64: 8>}, {pipeline_mode = #tpu.pipeline_mode<synchronous>, transform_indices = @transform_3, window_bounds = array<i64: 22, 128>}, {pipeline_mode = #tpu.pipeline_mode<synchronous>, transform_indices = @transform_4, window_bounds = array<i64: 10, 128>}, {pipeline_mode = #tpu.pipeline_mode<synchronous>, transform_indices = @transform_5, window_bounds = array<i64: 20, 128>}, {pipeline_mode = #tpu.pipeline_mode<synchronous>, transform_indices = @transform_6, window_bounds = array<i64: 1, 128>}, {transform_indices = @transform_7, window_bounds = array<i64: 8, 128>}]} {
    %c8_i32 = arith.constant 8 : i32
    %0 = arith.muli %arg0, %c8_i32 : i32
    %c0 = arith.constant 0 : index
    %c0_0 = arith.constant 0 : index
    %1 = vector.load %arg7[%c0, %c0_0] : memref<1x128xf32, #tpu.memory_space<vmem>>, vector<1x128xf32>
    %c0_i32 = arith.constant 0 : i32
    %2 = arith.addi %0, %c0_i32 : i32
    %c5_i32 = arith.constant 5 : i32
    %3 = arith.muli %2, %c5_i32 : i32
    %cst = arith.constant 0.000000e+00 : f32
    %4 = vector.broadcast %cst : f32 to vector<1x128xf32>
    %c0_i32_1 = arith.constant 0 : i32
    %5 = arith.addi %3, %c0_i32_1 : i32
    %6 = arith.index_cast %5 : i32 to index
    %7 = memref.load %arg1[%6] : memref<40xi32, #tpu.memory_space<smem>>
    %c0_i32_2 = arith.constant 0 : i32
    %8 = arith.addi %3, %c0_i32_2 : i32
    %9 = arith.index_cast %8 : i32 to index
    %10 = memref.load %arg2[%9] : memref<40xi32, #tpu.memory_space<smem>>
    %11 = arith.index_cast %7 : i32 to index
    %c0_3 = arith.constant 0 : index
    %12 = vector.load %arg4[%11, %c0_3] : memref<22x128xf32, #tpu.memory_space<vmem>>, vector<1x128xf32>
    %13 = arith.index_cast %10 : i32 to index
    %c0_4 = arith.constant 0 : index
    %14 = vector.load %arg5[%13, %c0_4] : memref<10x128xf32, #tpu.memory_space<vmem>>, vector<1x128xf32>
    %15 = arith.mulf %12, %14 : vector<1x128xf32>
    %16 = arith.addf %4, %15 : vector<1x128xf32>
    %c1_i32 = arith.constant 1 : i32
    %17 = arith.addi %3, %c1_i32 : i32
    %18 = arith.index_cast %17 : i32 to index
    %19 = memref.load %arg1[%18] : memref<40xi32, #tpu.memory_space<smem>>
    %c1_i32_5 = arith.constant 1 : i32
    %20 = arith.addi %3, %c1_i32_5 : i32
    %21 = arith.index_cast %20 : i32 to index
    %22 = memref.load %arg2[%21] : memref<40xi32, #tpu.memory_space<smem>>
    %23 = arith.index_cast %19 : i32 to index
    %c0_6 = arith.constant 0 : index
    %24 = vector.load %arg4[%23, %c0_6] : memref<22x128xf32, #tpu.memory_space<vmem>>, vector<1x128xf32>
    %25 = arith.index_cast %22 : i32 to index
    %c0_7 = arith.constant 0 : index
    %26 = vector.load %arg5[%25, %c0_7] : memref<10x128xf32, #tpu.memory_space<vmem>>, vector<1x128xf32>
    %27 = arith.mulf %24, %26 : vector<1x128xf32>
    %28 = arith.addf %16, %27 : vector<1x128xf32>
    %c2_i32 = arith.constant 2 : i32
    %29 = arith.addi %3, %c2_i32 : i32
    %30 = arith.index_cast %29 : i32 to index
    %31 = memref.load %arg1[%30] : memref<40xi32, #tpu.memory_space<smem>>
    %c2_i32_8 = arith.constant 2 : i32
    %32 = arith.addi %3, %c2_i32_8 : i32
    %33 = arith.index_cast %32 : i32 to index
    %34 = memref.load %arg2[%33] : memref<40xi32, #tpu.memory_space<smem>>
    %35 = arith.index_cast %31 : i32 to index
    %c0_9 = arith.constant 0 : index
    %36 = vector.load %arg4[%35, %c0_9] : memref<22x128xf32, #tpu.memory_space<vmem>>, vector<1x128xf32>
    %37 = arith.index_cast %34 : i32 to index
    %c0_10 = arith.constant 0 : index
    %38 = vector.load %arg5[%37, %c0_10] : memref<10x128xf32, #tpu.memory_space<vmem>>, vector<1x128xf32>
    %39 = arith.mulf %36, %38 : vector<1x128xf32>
    %40 = arith.addf %28, %39 : vector<1x128xf32>
    %c3_i32 = arith.constant 3 : i32
    %41 = arith.addi %3, %c3_i32 : i32
    %42 = arith.index_cast %41 : i32 to index
    %43 = memref.load %arg1[%42] : memref<40xi32, #tpu.memory_space<smem>>
    %c3_i32_11 = arith.constant 3 : i32
    %44 = arith.addi %3, %c3_i32_11 : i32
    %45 = arith.index_cast %44 : i32 to index
    %46 = memref.load %arg2[%45] : memref<40xi32, #tpu.memory_space<smem>>
    %47 = arith.index_cast %43 : i32 to index
    %c0_12 = arith.constant 0 : index
    %48 = vector.load %arg4[%47, %c0_12] : memref<22x128xf32, #tpu.memory_space<vmem>>, vector<1x128xf32>
    %49 = arith.index_cast %46 : i32 to index
    %c0_13 = arith.constant 0 : index
    %50 = vector.load %arg5[%49, %c0_13] : memref<10x128xf32, #tpu.memory_space<vmem>>, vector<1x128xf32>
    %51 = arith.mulf %48, %50 : vector<1x128xf32>
    %52 = arith.addf %40, %51 : vector<1x128xf32>
    %c4_i32 = arith.constant 4 : i32
    %53 = arith.addi %3, %c4_i32 : i32
    %54 = arith.index_cast %53 : i32 to index
    %55 = memref.load %arg1[%54] : memref<40xi32, #tpu.memory_space<smem>>
    %c4_i32_14 = arith.constant 4 : i32
    %56 = arith.addi %3, %c4_i32_14 : i32
    %57 = arith.index_cast %56 : i32 to index
    %58 = memref.load %arg2[%57] : memref<40xi32, #tpu.memory_space<smem>>
    %59 = arith.index_cast %55 : i32 to index
    %c0_15 = arith.constant 0 : index
    %60 = vector.load %arg4[%59, %c0_15] : memref<22x128xf32, #tpu.memory_space<vmem>>, vector<1x128xf32>
    %61 = arith.index_cast %58 : i32 to index
    %c0_16 = arith.constant 0 : index
    %62 = vector.load %arg5[%61, %c0_16] : memref<10x128xf32, #tpu.memory_space<vmem>>, vector<1x128xf32>
    %63 = arith.mulf %60, %62 : vector<1x128xf32>
    %64 = arith.addf %52, %63 : vector<1x128xf32>
    %65 = arith.index_cast %2 : i32 to index
    %66 = memref.load %arg3[%65] : memref<8xi32, #tpu.memory_space<smem>>
    %67 = arith.index_cast %66 : i32 to index
    %c0_17 = arith.constant 0 : index
    %68 = vector.load %arg6[%67, %c0_17] : memref<20x128xf32, #tpu.memory_space<vmem>>, vector<1x128xf32>
    %69 = arith.addf %64, %68 : vector<1x128xf32>
    %c1_i32_18 = arith.constant 1 : i32
    %70 = arith.addi %0, %c1_i32_18 : i32
    %c5_i32_19 = arith.constant 5 : i32
    %71 = arith.muli %70, %c5_i32_19 : i32
    %cst_20 = arith.constant 0.000000e+00 : f32
    %72 = vector.broadcast %cst_20 : f32 to vector<1x128xf32>
    %c0_i32_21 = arith.constant 0 : i32
    %73 = arith.addi %71, %c0_i32_21 : i32
    %74 = arith.index_cast %73 : i32 to index
    %75 = memref.load %arg1[%74] : memref<40xi32, #tpu.memory_space<smem>>
    %c0_i32_22 = arith.constant 0 : i32
    %76 = arith.addi %71, %c0_i32_22 : i32
    %77 = arith.index_cast %76 : i32 to index
    %78 = memref.load %arg2[%77] : memref<40xi32, #tpu.memory_space<smem>>
    %79 = arith.index_cast %75 : i32 to index
    %c0_23 = arith.constant 0 : index
    %80 = vector.load %arg4[%79, %c0_23] : memref<22x128xf32, #tpu.memory_space<vmem>>, vector<1x128xf32>
    %81 = arith.index_cast %78 : i32 to index
    %c0_24 = arith.constant 0 : index
    %82 = vector.load %arg5[%81, %c0_24] : memref<10x128xf32, #tpu.memory_space<vmem>>, vector<1x128xf32>
    %83 = arith.mulf %80, %82 : vector<1x128xf32>
    %84 = arith.addf %72, %83 : vector<1x128xf32>
    %c1_i32_25 = arith.constant 1 : i32
    %85 = arith.addi %71, %c1_i32_25 : i32
    %86 = arith.index_cast %85 : i32 to index
    %87 = memref.load %arg1[%86] : memref<40xi32, #tpu.memory_space<smem>>
    %c1_i32_26 = arith.constant 1 : i32
    %88 = arith.addi %71, %c1_i32_26 : i32
    %89 = arith.index_cast %88 : i32 to index
    %90 = memref.load %arg2[%89] : memref<40xi32, #tpu.memory_space<smem>>
    %91 = arith.index_cast %87 : i32 to index
    %c0_27 = arith.constant 0 : index
    %92 = vector.load %arg4[%91, %c0_27] : memref<22x128xf32, #tpu.memory_space<vmem>>, vector<1x128xf32>
    %93 = arith.index_cast %90 : i32 to index
    %c0_28 = arith.constant 0 : index
    %94 = vector.load %arg5[%93, %c0_28] : memref<10x128xf32, #tpu.memory_space<vmem>>, vector<1x128xf32>
    %95 = arith.mulf %92, %94 : vector<1x128xf32>
    %96 = arith.addf %84, %95 : vector<1x128xf32>
    %c2_i32_29 = arith.constant 2 : i32
    %97 = arith.addi %71, %c2_i32_29 : i32
    %98 = arith.index_cast %97 : i32 to index
    %99 = memref.load %arg1[%98] : memref<40xi32, #tpu.memory_space<smem>>
    %c2_i32_30 = arith.constant 2 : i32
    %100 = arith.addi %71, %c2_i32_30 : i32
    %101 = arith.index_cast %100 : i32 to index
    %102 = memref.load %arg2[%101] : memref<40xi32, #tpu.memory_space<smem>>
    %103 = arith.index_cast %99 : i32 to index
    %c0_31 = arith.constant 0 : index
    %104 = vector.load %arg4[%103, %c0_31] : memref<22x128xf32, #tpu.memory_space<vmem>>, vector<1x128xf32>
    %105 = arith.index_cast %102 : i32 to index
    %c0_32 = arith.constant 0 : index
    %106 = vector.load %arg5[%105, %c0_32] : memref<10x128xf32, #tpu.memory_space<vmem>>, vector<1x128xf32>
    %107 = arith.mulf %104, %106 : vector<1x128xf32>
    %108 = arith.addf %96, %107 : vector<1x128xf32>
    %c3_i32_33 = arith.constant 3 : i32
    %109 = arith.addi %71, %c3_i32_33 : i32
    %110 = arith.index_cast %109 : i32 to index
    %111 = memref.load %arg1[%110] : memref<40xi32, #tpu.memory_space<smem>>
    %c3_i32_34 = arith.constant 3 : i32
    %112 = arith.addi %71, %c3_i32_34 : i32
    %113 = arith.index_cast %112 : i32 to index
    %114 = memref.load %arg2[%113] : memref<40xi32, #tpu.memory_space<smem>>
    %115 = arith.index_cast %111 : i32 to index
    %c0_35 = arith.constant 0 : index
    %116 = vector.load %arg4[%115, %c0_35] : memref<22x128xf32, #tpu.memory_space<vmem>>, vector<1x128xf32>
    %117 = arith.index_cast %114 : i32 to index
    %c0_36 = arith.constant 0 : index
    %118 = vector.load %arg5[%117, %c0_36] : memref<10x128xf32, #tpu.memory_space<vmem>>, vector<1x128xf32>
    %119 = arith.mulf %116, %118 : vector<1x128xf32>
    %120 = arith.addf %108, %119 : vector<1x128xf32>
    %c4_i32_37 = arith.constant 4 : i32
    %121 = arith.addi %71, %c4_i32_37 : i32
    %122 = arith.index_cast %121 : i32 to index
    %123 = memref.load %arg1[%122] : memref<40xi32, #tpu.memory_space<smem>>
    %c4_i32_38 = arith.constant 4 : i32
    %124 = arith.addi %71, %c4_i32_38 : i32
    %125 = arith.index_cast %124 : i32 to index
    %126 = memref.load %arg2[%125] : memref<40xi32, #tpu.memory_space<smem>>
    %127 = arith.index_cast %123 : i32 to index
    %c0_39 = arith.constant 0 : index
    %128 = vector.load %arg4[%127, %c0_39] : memref<22x128xf32, #tpu.memory_space<vmem>>, vector<1x128xf32>
    %129 = arith.index_cast %126 : i32 to index
    %c0_40 = arith.constant 0 : index
    %130 = vector.load %arg5[%129, %c0_40] : memref<10x128xf32, #tpu.memory_space<vmem>>, vector<1x128xf32>
    %131 = arith.mulf %128, %130 : vector<1x128xf32>
    %132 = arith.addf %120, %131 : vector<1x128xf32>
    %133 = arith.index_cast %70 : i32 to index
    %134 = memref.load %arg3[%133] : memref<8xi32, #tpu.memory_space<smem>>
    %135 = arith.index_cast %134 : i32 to index
    %c0_41 = arith.constant 0 : index
    %136 = vector.load %arg6[%135, %c0_41] : memref<20x128xf32, #tpu.memory_space<vmem>>, vector<1x128xf32>
    %137 = arith.addf %132, %136 : vector<1x128xf32>
    %c2_i32_42 = arith.constant 2 : i32
    %138 = arith.addi %0, %c2_i32_42 : i32
    %c5_i32_43 = arith.constant 5 : i32
    %139 = arith.muli %138, %c5_i32_43 : i32
    %cst_44 = arith.constant 0.000000e+00 : f32
    %140 = vector.broadcast %cst_44 : f32 to vector<1x128xf32>
    %c0_i32_45 = arith.constant 0 : i32
    %141 = arith.addi %139, %c0_i32_45 : i32
    %142 = arith.index_cast %141 : i32 to index
    %143 = memref.load %arg1[%142] : memref<40xi32, #tpu.memory_space<smem>>
    %c0_i32_46 = arith.constant 0 : i32
    %144 = arith.addi %139, %c0_i32_46 : i32
    %145 = arith.index_cast %144 : i32 to index
    %146 = memref.load %arg2[%145] : memref<40xi32, #tpu.memory_space<smem>>
    %147 = arith.index_cast %143 : i32 to index
    %c0_47 = arith.constant 0 : index
    %148 = vector.load %arg4[%147, %c0_47] : memref<22x128xf32, #tpu.memory_space<vmem>>, vector<1x128xf32>
    %149 = arith.index_cast %146 : i32 to index
    %c0_48 = arith.constant 0 : index
    %150 = vector.load %arg5[%149, %c0_48] : memref<10x128xf32, #tpu.memory_space<vmem>>, vector<1x128xf32>
    %151 = arith.mulf %148, %150 : vector<1x128xf32>
    %152 = arith.addf %140, %151 : vector<1x128xf32>
    %c1_i32_49 = arith.constant 1 : i32
    %153 = arith.addi %139, %c1_i32_49 : i32
    %154 = arith.index_cast %153 : i32 to index
    %155 = memref.load %arg1[%154] : memref<40xi32, #tpu.memory_space<smem>>
    %c1_i32_50 = arith.constant 1 : i32
    %156 = arith.addi %139, %c1_i32_50 : i32
    %157 = arith.index_cast %156 : i32 to index
    %158 = memref.load %arg2[%157] : memref<40xi32, #tpu.memory_space<smem>>
    %159 = arith.index_cast %155 : i32 to index
    %c0_51 = arith.constant 0 : index
    %160 = vector.load %arg4[%159, %c0_51] : memref<22x128xf32, #tpu.memory_space<vmem>>, vector<1x128xf32>
    %161 = arith.index_cast %158 : i32 to index
    %c0_52 = arith.constant 0 : index
    %162 = vector.load %arg5[%161, %c0_52] : memref<10x128xf32, #tpu.memory_space<vmem>>, vector<1x128xf32>
    %163 = arith.mulf %160, %162 : vector<1x128xf32>
    %164 = arith.addf %152, %163 : vector<1x128xf32>
    %c2_i32_53 = arith.constant 2 : i32
    %165 = arith.addi %139, %c2_i32_53 : i32
    %166 = arith.index_cast %165 : i32 to index
    %167 = memref.load %arg1[%166] : memref<40xi32, #tpu.memory_space<smem>>
    %c2_i32_54 = arith.constant 2 : i32
    %168 = arith.addi %139, %c2_i32_54 : i32
    %169 = arith.index_cast %168 : i32 to index
    %170 = memref.load %arg2[%169] : memref<40xi32, #tpu.memory_space<smem>>
    %171 = arith.index_cast %167 : i32 to index
    %c0_55 = arith.constant 0 : index
    %172 = vector.load %arg4[%171, %c0_55] : memref<22x128xf32, #tpu.memory_space<vmem>>, vector<1x128xf32>
    %173 = arith.index_cast %170 : i32 to index
    %c0_56 = arith.constant 0 : index
    %174 = vector.load %arg5[%173, %c0_56] : memref<10x128xf32, #tpu.memory_space<vmem>>, vector<1x128xf32>
    %175 = arith.mulf %172, %174 : vector<1x128xf32>
    %176 = arith.addf %164, %175 : vector<1x128xf32>
    %c3_i32_57 = arith.constant 3 : i32
    %177 = arith.addi %139, %c3_i32_57 : i32
    %178 = arith.index_cast %177 : i32 to index
    %179 = memref.load %arg1[%178] : memref<40xi32, #tpu.memory_space<smem>>
    %c3_i32_58 = arith.constant 3 : i32
    %180 = arith.addi %139, %c3_i32_58 : i32
    %181 = arith.index_cast %180 : i32 to index
    %182 = memref.load %arg2[%181] : memref<40xi32, #tpu.memory_space<smem>>
    %183 = arith.index_cast %179 : i32 to index
    %c0_59 = arith.constant 0 : index
    %184 = vector.load %arg4[%183, %c0_59] : memref<22x128xf32, #tpu.memory_space<vmem>>, vector<1x128xf32>
    %185 = arith.index_cast %182 : i32 to index
    %c0_60 = arith.constant 0 : index
    %186 = vector.load %arg5[%185, %c0_60] : memref<10x128xf32, #tpu.memory_space<vmem>>, vector<1x128xf32>
    %187 = arith.mulf %184, %186 : vector<1x128xf32>
    %188 = arith.addf %176, %187 : vector<1x128xf32>
    %c4_i32_61 = arith.constant 4 : i32
    %189 = arith.addi %139, %c4_i32_61 : i32
    %190 = arith.index_cast %189 : i32 to index
    %191 = memref.load %arg1[%190] : memref<40xi32, #tpu.memory_space<smem>>
    %c4_i32_62 = arith.constant 4 : i32
    %192 = arith.addi %139, %c4_i32_62 : i32
    %193 = arith.index_cast %192 : i32 to index
    %194 = memref.load %arg2[%193] : memref<40xi32, #tpu.memory_space<smem>>
    %195 = arith.index_cast %191 : i32 to index
    %c0_63 = arith.constant 0 : index
    %196 = vector.load %arg4[%195, %c0_63] : memref<22x128xf32, #tpu.memory_space<vmem>>, vector<1x128xf32>
    %197 = arith.index_cast %194 : i32 to index
    %c0_64 = arith.constant 0 : index
    %198 = vector.load %arg5[%197, %c0_64] : memref<10x128xf32, #tpu.memory_space<vmem>>, vector<1x128xf32>
    %199 = arith.mulf %196, %198 : vector<1x128xf32>
    %200 = arith.addf %188, %199 : vector<1x128xf32>
    %201 = arith.index_cast %138 : i32 to index
    %202 = memref.load %arg3[%201] : memref<8xi32, #tpu.memory_space<smem>>
    %203 = arith.index_cast %202 : i32 to index
    %c0_65 = arith.constant 0 : index
    %204 = vector.load %arg6[%203, %c0_65] : memref<20x128xf32, #tpu.memory_space<vmem>>, vector<1x128xf32>
    %205 = arith.addf %200, %204 : vector<1x128xf32>
    %c3_i32_66 = arith.constant 3 : i32
    %206 = arith.addi %0, %c3_i32_66 : i32
    %c5_i32_67 = arith.constant 5 : i32
    %207 = arith.muli %206, %c5_i32_67 : i32
    %cst_68 = arith.constant 0.000000e+00 : f32
    %208 = vector.broadcast %cst_68 : f32 to vector<1x128xf32>
    %c0_i32_69 = arith.constant 0 : i32
    %209 = arith.addi %207, %c0_i32_69 : i32
    %210 = arith.index_cast %209 : i32 to index
    %211 = memref.load %arg1[%210] : memref<40xi32, #tpu.memory_space<smem>>
    %c0_i32_70 = arith.constant 0 : i32
    %212 = arith.addi %207, %c0_i32_70 : i32
    %213 = arith.index_cast %212 : i32 to index
    %214 = memref.load %arg2[%213] : memref<40xi32, #tpu.memory_space<smem>>
    %215 = arith.index_cast %211 : i32 to index
    %c0_71 = arith.constant 0 : index
    %216 = vector.load %arg4[%215, %c0_71] : memref<22x128xf32, #tpu.memory_space<vmem>>, vector<1x128xf32>
    %217 = arith.index_cast %214 : i32 to index
    %c0_72 = arith.constant 0 : index
    %218 = vector.load %arg5[%217, %c0_72] : memref<10x128xf32, #tpu.memory_space<vmem>>, vector<1x128xf32>
    %219 = arith.mulf %216, %218 : vector<1x128xf32>
    %220 = arith.addf %208, %219 : vector<1x128xf32>
    %c1_i32_73 = arith.constant 1 : i32
    %221 = arith.addi %207, %c1_i32_73 : i32
    %222 = arith.index_cast %221 : i32 to index
    %223 = memref.load %arg1[%222] : memref<40xi32, #tpu.memory_space<smem>>
    %c1_i32_74 = arith.constant 1 : i32
    %224 = arith.addi %207, %c1_i32_74 : i32
    %225 = arith.index_cast %224 : i32 to index
    %226 = memref.load %arg2[%225] : memref<40xi32, #tpu.memory_space<smem>>
    %227 = arith.index_cast %223 : i32 to index
    %c0_75 = arith.constant 0 : index
    %228 = vector.load %arg4[%227, %c0_75] : memref<22x128xf32, #tpu.memory_space<vmem>>, vector<1x128xf32>
    %229 = arith.index_cast %226 : i32 to index
    %c0_76 = arith.constant 0 : index
    %230 = vector.load %arg5[%229, %c0_76] : memref<10x128xf32, #tpu.memory_space<vmem>>, vector<1x128xf32>
    %231 = arith.mulf %228, %230 : vector<1x128xf32>
    %232 = arith.addf %220, %231 : vector<1x128xf32>
    %c2_i32_77 = arith.constant 2 : i32
    %233 = arith.addi %207, %c2_i32_77 : i32
    %234 = arith.index_cast %233 : i32 to index
    %235 = memref.load %arg1[%234] : memref<40xi32, #tpu.memory_space<smem>>
    %c2_i32_78 = arith.constant 2 : i32
    %236 = arith.addi %207, %c2_i32_78 : i32
    %237 = arith.index_cast %236 : i32 to index
    %238 = memref.load %arg2[%237] : memref<40xi32, #tpu.memory_space<smem>>
    %239 = arith.index_cast %235 : i32 to index
    %c0_79 = arith.constant 0 : index
    %240 = vector.load %arg4[%239, %c0_79] : memref<22x128xf32, #tpu.memory_space<vmem>>, vector<1x128xf32>
    %241 = arith.index_cast %238 : i32 to index
    %c0_80 = arith.constant 0 : index
    %242 = vector.load %arg5[%241, %c0_80] : memref<10x128xf32, #tpu.memory_space<vmem>>, vector<1x128xf32>
    %243 = arith.mulf %240, %242 : vector<1x128xf32>
    %244 = arith.addf %232, %243 : vector<1x128xf32>
    %c3_i32_81 = arith.constant 3 : i32
    %245 = arith.addi %207, %c3_i32_81 : i32
    %246 = arith.index_cast %245 : i32 to index
    %247 = memref.load %arg1[%246] : memref<40xi32, #tpu.memory_space<smem>>
    %c3_i32_82 = arith.constant 3 : i32
    %248 = arith.addi %207, %c3_i32_82 : i32
    %249 = arith.index_cast %248 : i32 to index
    %250 = memref.load %arg2[%249] : memref<40xi32, #tpu.memory_space<smem>>
    %251 = arith.index_cast %247 : i32 to index
    %c0_83 = arith.constant 0 : index
    %252 = vector.load %arg4[%251, %c0_83] : memref<22x128xf32, #tpu.memory_space<vmem>>, vector<1x128xf32>
    %253 = arith.index_cast %250 : i32 to index
    %c0_84 = arith.constant 0 : index
    %254 = vector.load %arg5[%253, %c0_84] : memref<10x128xf32, #tpu.memory_space<vmem>>, vector<1x128xf32>
    %255 = arith.mulf %252, %254 : vector<1x128xf32>
    %256 = arith.addf %244, %255 : vector<1x128xf32>
    %c4_i32_85 = arith.constant 4 : i32
    %257 = arith.addi %207, %c4_i32_85 : i32
    %258 = arith.index_cast %257 : i32 to index
    %259 = memref.load %arg1[%258] : memref<40xi32, #tpu.memory_space<smem>>
    %c4_i32_86 = arith.constant 4 : i32
    %260 = arith.addi %207, %c4_i32_86 : i32
    %261 = arith.index_cast %260 : i32 to index
    %262 = memref.load %arg2[%261] : memref<40xi32, #tpu.memory_space<smem>>
    %263 = arith.index_cast %259 : i32 to index
    %c0_87 = arith.constant 0 : index
    %264 = vector.load %arg4[%263, %c0_87] : memref<22x128xf32, #tpu.memory_space<vmem>>, vector<1x128xf32>
    %265 = arith.index_cast %262 : i32 to index
    %c0_88 = arith.constant 0 : index
    %266 = vector.load %arg5[%265, %c0_88] : memref<10x128xf32, #tpu.memory_space<vmem>>, vector<1x128xf32>
    %267 = arith.mulf %264, %266 : vector<1x128xf32>
    %268 = arith.addf %256, %267 : vector<1x128xf32>
    %269 = arith.index_cast %206 : i32 to index
    %270 = memref.load %arg3[%269] : memref<8xi32, #tpu.memory_space<smem>>
    %271 = arith.index_cast %270 : i32 to index
    %c0_89 = arith.constant 0 : index
    %272 = vector.load %arg6[%271, %c0_89] : memref<20x128xf32, #tpu.memory_space<vmem>>, vector<1x128xf32>
    %273 = arith.addf %268, %272 : vector<1x128xf32>
    %c4_i32_90 = arith.constant 4 : i32
    %274 = arith.addi %0, %c4_i32_90 : i32
    %c5_i32_91 = arith.constant 5 : i32
    %275 = arith.muli %274, %c5_i32_91 : i32
    %cst_92 = arith.constant 0.000000e+00 : f32
    %276 = vector.broadcast %cst_92 : f32 to vector<1x128xf32>
    %c0_i32_93 = arith.constant 0 : i32
    %277 = arith.addi %275, %c0_i32_93 : i32
    %278 = arith.index_cast %277 : i32 to index
    %279 = memref.load %arg1[%278] : memref<40xi32, #tpu.memory_space<smem>>
    %c0_i32_94 = arith.constant 0 : i32
    %280 = arith.addi %275, %c0_i32_94 : i32
    %281 = arith.index_cast %280 : i32 to index
    %282 = memref.load %arg2[%281] : memref<40xi32, #tpu.memory_space<smem>>
    %283 = arith.index_cast %279 : i32 to index
    %c0_95 = arith.constant 0 : index
    %284 = vector.load %arg4[%283, %c0_95] : memref<22x128xf32, #tpu.memory_space<vmem>>, vector<1x128xf32>
    %285 = arith.index_cast %282 : i32 to index
    %c0_96 = arith.constant 0 : index
    %286 = vector.load %arg5[%285, %c0_96] : memref<10x128xf32, #tpu.memory_space<vmem>>, vector<1x128xf32>
    %287 = arith.mulf %284, %286 : vector<1x128xf32>
    %288 = arith.addf %276, %287 : vector<1x128xf32>
    %c1_i32_97 = arith.constant 1 : i32
    %289 = arith.addi %275, %c1_i32_97 : i32
    %290 = arith.index_cast %289 : i32 to index
    %291 = memref.load %arg1[%290] : memref<40xi32, #tpu.memory_space<smem>>
    %c1_i32_98 = arith.constant 1 : i32
    %292 = arith.addi %275, %c1_i32_98 : i32
    %293 = arith.index_cast %292 : i32 to index
    %294 = memref.load %arg2[%293] : memref<40xi32, #tpu.memory_space<smem>>
    %295 = arith.index_cast %291 : i32 to index
    %c0_99 = arith.constant 0 : index
    %296 = vector.load %arg4[%295, %c0_99] : memref<22x128xf32, #tpu.memory_space<vmem>>, vector<1x128xf32>
    %297 = arith.index_cast %294 : i32 to index
    %c0_100 = arith.constant 0 : index
    %298 = vector.load %arg5[%297, %c0_100] : memref<10x128xf32, #tpu.memory_space<vmem>>, vector<1x128xf32>
    %299 = arith.mulf %296, %298 : vector<1x128xf32>
    %300 = arith.addf %288, %299 : vector<1x128xf32>
    %c2_i32_101 = arith.constant 2 : i32
    %301 = arith.addi %275, %c2_i32_101 : i32
    %302 = arith.index_cast %301 : i32 to index
    %303 = memref.load %arg1[%302] : memref<40xi32, #tpu.memory_space<smem>>
    %c2_i32_102 = arith.constant 2 : i32
    %304 = arith.addi %275, %c2_i32_102 : i32
    %305 = arith.index_cast %304 : i32 to index
    %306 = memref.load %arg2[%305] : memref<40xi32, #tpu.memory_space<smem>>
    %307 = arith.index_cast %303 : i32 to index
    %c0_103 = arith.constant 0 : index
    %308 = vector.load %arg4[%307, %c0_103] : memref<22x128xf32, #tpu.memory_space<vmem>>, vector<1x128xf32>
    %309 = arith.index_cast %306 : i32 to index
    %c0_104 = arith.constant 0 : index
    %310 = vector.load %arg5[%309, %c0_104] : memref<10x128xf32, #tpu.memory_space<vmem>>, vector<1x128xf32>
    %311 = arith.mulf %308, %310 : vector<1x128xf32>
    %312 = arith.addf %300, %311 : vector<1x128xf32>
    %c3_i32_105 = arith.constant 3 : i32
    %313 = arith.addi %275, %c3_i32_105 : i32
    %314 = arith.index_cast %313 : i32 to index
    %315 = memref.load %arg1[%314] : memref<40xi32, #tpu.memory_space<smem>>
    %c3_i32_106 = arith.constant 3 : i32
    %316 = arith.addi %275, %c3_i32_106 : i32
    %317 = arith.index_cast %316 : i32 to index
    %318 = memref.load %arg2[%317] : memref<40xi32, #tpu.memory_space<smem>>
    %319 = arith.index_cast %315 : i32 to index
    %c0_107 = arith.constant 0 : index
    %320 = vector.load %arg4[%319, %c0_107] : memref<22x128xf32, #tpu.memory_space<vmem>>, vector<1x128xf32>
    %321 = arith.index_cast %318 : i32 to index
    %c0_108 = arith.constant 0 : index
    %322 = vector.load %arg5[%321, %c0_108] : memref<10x128xf32, #tpu.memory_space<vmem>>, vector<1x128xf32>
    %323 = arith.mulf %320, %322 : vector<1x128xf32>
    %324 = arith.addf %312, %323 : vector<1x128xf32>
    %c4_i32_109 = arith.constant 4 : i32
    %325 = arith.addi %275, %c4_i32_109 : i32
    %326 = arith.index_cast %325 : i32 to index
    %327 = memref.load %arg1[%326] : memref<40xi32, #tpu.memory_space<smem>>
    %c4_i32_110 = arith.constant 4 : i32
    %328 = arith.addi %275, %c4_i32_110 : i32
    %329 = arith.index_cast %328 : i32 to index
    %330 = memref.load %arg2[%329] : memref<40xi32, #tpu.memory_space<smem>>
    %331 = arith.index_cast %327 : i32 to index
    %c0_111 = arith.constant 0 : index
    %332 = vector.load %arg4[%331, %c0_111] : memref<22x128xf32, #tpu.memory_space<vmem>>, vector<1x128xf32>
    %333 = arith.index_cast %330 : i32 to index
    %c0_112 = arith.constant 0 : index
    %334 = vector.load %arg5[%333, %c0_112] : memref<10x128xf32, #tpu.memory_space<vmem>>, vector<1x128xf32>
    %335 = arith.mulf %332, %334 : vector<1x128xf32>
    %336 = arith.addf %324, %335 : vector<1x128xf32>
    %337 = arith.index_cast %274 : i32 to index
    %338 = memref.load %arg3[%337] : memref<8xi32, #tpu.memory_space<smem>>
    %339 = arith.index_cast %338 : i32 to index
    %c0_113 = arith.constant 0 : index
    %340 = vector.load %arg6[%339, %c0_113] : memref<20x128xf32, #tpu.memory_space<vmem>>, vector<1x128xf32>
    %341 = arith.addf %336, %340 : vector<1x128xf32>
    %c5_i32_114 = arith.constant 5 : i32
    %342 = arith.addi %0, %c5_i32_114 : i32
    %c5_i32_115 = arith.constant 5 : i32
    %343 = arith.muli %342, %c5_i32_115 : i32
    %cst_116 = arith.constant 0.000000e+00 : f32
    %344 = vector.broadcast %cst_116 : f32 to vector<1x128xf32>
    %c0_i32_117 = arith.constant 0 : i32
    %345 = arith.addi %343, %c0_i32_117 : i32
    %346 = arith.index_cast %345 : i32 to index
    %347 = memref.load %arg1[%346] : memref<40xi32, #tpu.memory_space<smem>>
    %c0_i32_118 = arith.constant 0 : i32
    %348 = arith.addi %343, %c0_i32_118 : i32
    %349 = arith.index_cast %348 : i32 to index
    %350 = memref.load %arg2[%349] : memref<40xi32, #tpu.memory_space<smem>>
    %351 = arith.index_cast %347 : i32 to index
    %c0_119 = arith.constant 0 : index
    %352 = vector.load %arg4[%351, %c0_119] : memref<22x128xf32, #tpu.memory_space<vmem>>, vector<1x128xf32>
    %353 = arith.index_cast %350 : i32 to index
    %c0_120 = arith.constant 0 : index
    %354 = vector.load %arg5[%353, %c0_120] : memref<10x128xf32, #tpu.memory_space<vmem>>, vector<1x128xf32>
    %355 = arith.mulf %352, %354 : vector<1x128xf32>
    %356 = arith.addf %344, %355 : vector<1x128xf32>
    %c1_i32_121 = arith.constant 1 : i32
    %357 = arith.addi %343, %c1_i32_121 : i32
    %358 = arith.index_cast %357 : i32 to index
    %359 = memref.load %arg1[%358] : memref<40xi32, #tpu.memory_space<smem>>
    %c1_i32_122 = arith.constant 1 : i32
    %360 = arith.addi %343, %c1_i32_122 : i32
    %361 = arith.index_cast %360 : i32 to index
    %362 = memref.load %arg2[%361] : memref<40xi32, #tpu.memory_space<smem>>
    %363 = arith.index_cast %359 : i32 to index
    %c0_123 = arith.constant 0 : index
    %364 = vector.load %arg4[%363, %c0_123] : memref<22x128xf32, #tpu.memory_space<vmem>>, vector<1x128xf32>
    %365 = arith.index_cast %362 : i32 to index
    %c0_124 = arith.constant 0 : index
    %366 = vector.load %arg5[%365, %c0_124] : memref<10x128xf32, #tpu.memory_space<vmem>>, vector<1x128xf32>
    %367 = arith.mulf %364, %366 : vector<1x128xf32>
    %368 = arith.addf %356, %367 : vector<1x128xf32>
    %c2_i32_125 = arith.constant 2 : i32
    %369 = arith.addi %343, %c2_i32_125 : i32
    %370 = arith.index_cast %369 : i32 to index
    %371 = memref.load %arg1[%370] : memref<40xi32, #tpu.memory_space<smem>>
    %c2_i32_126 = arith.constant 2 : i32
    %372 = arith.addi %343, %c2_i32_126 : i32
    %373 = arith.index_cast %372 : i32 to index
    %374 = memref.load %arg2[%373] : memref<40xi32, #tpu.memory_space<smem>>
    %375 = arith.index_cast %371 : i32 to index
    %c0_127 = arith.constant 0 : index
    %376 = vector.load %arg4[%375, %c0_127] : memref<22x128xf32, #tpu.memory_space<vmem>>, vector<1x128xf32>
    %377 = arith.index_cast %374 : i32 to index
    %c0_128 = arith.constant 0 : index
    %378 = vector.load %arg5[%377, %c0_128] : memref<10x128xf32, #tpu.memory_space<vmem>>, vector<1x128xf32>
    %379 = arith.mulf %376, %378 : vector<1x128xf32>
    %380 = arith.addf %368, %379 : vector<1x128xf32>
    %c3_i32_129 = arith.constant 3 : i32
    %381 = arith.addi %343, %c3_i32_129 : i32
    %382 = arith.index_cast %381 : i32 to index
    %383 = memref.load %arg1[%382] : memref<40xi32, #tpu.memory_space<smem>>
    %c3_i32_130 = arith.constant 3 : i32
    %384 = arith.addi %343, %c3_i32_130 : i32
    %385 = arith.index_cast %384 : i32 to index
    %386 = memref.load %arg2[%385] : memref<40xi32, #tpu.memory_space<smem>>
    %387 = arith.index_cast %383 : i32 to index
    %c0_131 = arith.constant 0 : index
    %388 = vector.load %arg4[%387, %c0_131] : memref<22x128xf32, #tpu.memory_space<vmem>>, vector<1x128xf32>
    %389 = arith.index_cast %386 : i32 to index
    %c0_132 = arith.constant 0 : index
    %390 = vector.load %arg5[%389, %c0_132] : memref<10x128xf32, #tpu.memory_space<vmem>>, vector<1x128xf32>
    %391 = arith.mulf %388, %390 : vector<1x128xf32>
    %392 = arith.addf %380, %391 : vector<1x128xf32>
    %c4_i32_133 = arith.constant 4 : i32
    %393 = arith.addi %343, %c4_i32_133 : i32
    %394 = arith.index_cast %393 : i32 to index
    %395 = memref.load %arg1[%394] : memref<40xi32, #tpu.memory_space<smem>>
    %c4_i32_134 = arith.constant 4 : i32
    %396 = arith.addi %343, %c4_i32_134 : i32
    %397 = arith.index_cast %396 : i32 to index
    %398 = memref.load %arg2[%397] : memref<40xi32, #tpu.memory_space<smem>>
    %399 = arith.index_cast %395 : i32 to index
    %c0_135 = arith.constant 0 : index
    %400 = vector.load %arg4[%399, %c0_135] : memref<22x128xf32, #tpu.memory_space<vmem>>, vector<1x128xf32>
    %401 = arith.index_cast %398 : i32 to index
    %c0_136 = arith.constant 0 : index
    %402 = vector.load %arg5[%401, %c0_136] : memref<10x128xf32, #tpu.memory_space<vmem>>, vector<1x128xf32>
    %403 = arith.mulf %400, %402 : vector<1x128xf32>
    %404 = arith.addf %392, %403 : vector<1x128xf32>
    %405 = arith.index_cast %342 : i32 to index
    %406 = memref.load %arg3[%405] : memref<8xi32, #tpu.memory_space<smem>>
    %407 = arith.index_cast %406 : i32 to index
    %c0_137 = arith.constant 0 : index
    %408 = vector.load %arg6[%407, %c0_137] : memref<20x128xf32, #tpu.memory_space<vmem>>, vector<1x128xf32>
    %409 = arith.addf %404, %408 : vector<1x128xf32>
    %c6_i32 = arith.constant 6 : i32
    %410 = arith.addi %0, %c6_i32 : i32
    %c5_i32_138 = arith.constant 5 : i32
    %411 = arith.muli %410, %c5_i32_138 : i32
    %cst_139 = arith.constant 0.000000e+00 : f32
    %412 = vector.broadcast %cst_139 : f32 to vector<1x128xf32>
    %c0_i32_140 = arith.constant 0 : i32
    %413 = arith.addi %411, %c0_i32_140 : i32
    %414 = arith.index_cast %413 : i32 to index
    %415 = memref.load %arg1[%414] : memref<40xi32, #tpu.memory_space<smem>>
    %c0_i32_141 = arith.constant 0 : i32
    %416 = arith.addi %411, %c0_i32_141 : i32
    %417 = arith.index_cast %416 : i32 to index
    %418 = memref.load %arg2[%417] : memref<40xi32, #tpu.memory_space<smem>>
    %419 = arith.index_cast %415 : i32 to index
    %c0_142 = arith.constant 0 : index
    %420 = vector.load %arg4[%419, %c0_142] : memref<22x128xf32, #tpu.memory_space<vmem>>, vector<1x128xf32>
    %421 = arith.index_cast %418 : i32 to index
    %c0_143 = arith.constant 0 : index
    %422 = vector.load %arg5[%421, %c0_143] : memref<10x128xf32, #tpu.memory_space<vmem>>, vector<1x128xf32>
    %423 = arith.mulf %420, %422 : vector<1x128xf32>
    %424 = arith.addf %412, %423 : vector<1x128xf32>
    %c1_i32_144 = arith.constant 1 : i32
    %425 = arith.addi %411, %c1_i32_144 : i32
    %426 = arith.index_cast %425 : i32 to index
    %427 = memref.load %arg1[%426] : memref<40xi32, #tpu.memory_space<smem>>
    %c1_i32_145 = arith.constant 1 : i32
    %428 = arith.addi %411, %c1_i32_145 : i32
    %429 = arith.index_cast %428 : i32 to index
    %430 = memref.load %arg2[%429] : memref<40xi32, #tpu.memory_space<smem>>
    %431 = arith.index_cast %427 : i32 to index
    %c0_146 = arith.constant 0 : index
    %432 = vector.load %arg4[%431, %c0_146] : memref<22x128xf32, #tpu.memory_space<vmem>>, vector<1x128xf32>
    %433 = arith.index_cast %430 : i32 to index
    %c0_147 = arith.constant 0 : index
    %434 = vector.load %arg5[%433, %c0_147] : memref<10x128xf32, #tpu.memory_space<vmem>>, vector<1x128xf32>
    %435 = arith.mulf %432, %434 : vector<1x128xf32>
    %436 = arith.addf %424, %435 : vector<1x128xf32>
    %c2_i32_148 = arith.constant 2 : i32
    %437 = arith.addi %411, %c2_i32_148 : i32
    %438 = arith.index_cast %437 : i32 to index
    %439 = memref.load %arg1[%438] : memref<40xi32, #tpu.memory_space<smem>>
    %c2_i32_149 = arith.constant 2 : i32
    %440 = arith.addi %411, %c2_i32_149 : i32
    %441 = arith.index_cast %440 : i32 to index
    %442 = memref.load %arg2[%441] : memref<40xi32, #tpu.memory_space<smem>>
    %443 = arith.index_cast %439 : i32 to index
    %c0_150 = arith.constant 0 : index
    %444 = vector.load %arg4[%443, %c0_150] : memref<22x128xf32, #tpu.memory_space<vmem>>, vector<1x128xf32>
    %445 = arith.index_cast %442 : i32 to index
    %c0_151 = arith.constant 0 : index
    %446 = vector.load %arg5[%445, %c0_151] : memref<10x128xf32, #tpu.memory_space<vmem>>, vector<1x128xf32>
    %447 = arith.mulf %444, %446 : vector<1x128xf32>
    %448 = arith.addf %436, %447 : vector<1x128xf32>
    %c3_i32_152 = arith.constant 3 : i32
    %449 = arith.addi %411, %c3_i32_152 : i32
    %450 = arith.index_cast %449 : i32 to index
    %451 = memref.load %arg1[%450] : memref<40xi32, #tpu.memory_space<smem>>
    %c3_i32_153 = arith.constant 3 : i32
    %452 = arith.addi %411, %c3_i32_153 : i32
    %453 = arith.index_cast %452 : i32 to index
    %454 = memref.load %arg2[%453] : memref<40xi32, #tpu.memory_space<smem>>
    %455 = arith.index_cast %451 : i32 to index
    %c0_154 = arith.constant 0 : index
    %456 = vector.load %arg4[%455, %c0_154] : memref<22x128xf32, #tpu.memory_space<vmem>>, vector<1x128xf32>
    %457 = arith.index_cast %454 : i32 to index
    %c0_155 = arith.constant 0 : index
    %458 = vector.load %arg5[%457, %c0_155] : memref<10x128xf32, #tpu.memory_space<vmem>>, vector<1x128xf32>
    %459 = arith.mulf %456, %458 : vector<1x128xf32>
    %460 = arith.addf %448, %459 : vector<1x128xf32>
    %c4_i32_156 = arith.constant 4 : i32
    %461 = arith.addi %411, %c4_i32_156 : i32
    %462 = arith.index_cast %461 : i32 to index
    %463 = memref.load %arg1[%462] : memref<40xi32, #tpu.memory_space<smem>>
    %c4_i32_157 = arith.constant 4 : i32
    %464 = arith.addi %411, %c4_i32_157 : i32
    %465 = arith.index_cast %464 : i32 to index
    %466 = memref.load %arg2[%465] : memref<40xi32, #tpu.memory_space<smem>>
    %467 = arith.index_cast %463 : i32 to index
    %c0_158 = arith.constant 0 : index
    %468 = vector.load %arg4[%467, %c0_158] : memref<22x128xf32, #tpu.memory_space<vmem>>, vector<1x128xf32>
    %469 = arith.index_cast %466 : i32 to index
    %c0_159 = arith.constant 0 : index
    %470 = vector.load %arg5[%469, %c0_159] : memref<10x128xf32, #tpu.memory_space<vmem>>, vector<1x128xf32>
    %471 = arith.mulf %468, %470 : vector<1x128xf32>
    %472 = arith.addf %460, %471 : vector<1x128xf32>
    %473 = arith.index_cast %410 : i32 to index
    %474 = memref.load %arg3[%473] : memref<8xi32, #tpu.memory_space<smem>>
    %475 = arith.index_cast %474 : i32 to index
    %c0_160 = arith.constant 0 : index
    %476 = vector.load %arg6[%475, %c0_160] : memref<20x128xf32, #tpu.memory_space<vmem>>, vector<1x128xf32>
    %477 = arith.addf %472, %476 : vector<1x128xf32>
    %c7_i32 = arith.constant 7 : i32
    %478 = arith.addi %0, %c7_i32 : i32
    %c5_i32_161 = arith.constant 5 : i32
    %479 = arith.muli %478, %c5_i32_161 : i32
    %cst_162 = arith.constant 0.000000e+00 : f32
    %480 = vector.broadcast %cst_162 : f32 to vector<1x128xf32>
    %c0_i32_163 = arith.constant 0 : i32
    %481 = arith.addi %479, %c0_i32_163 : i32
    %482 = arith.index_cast %481 : i32 to index
    %483 = memref.load %arg1[%482] : memref<40xi32, #tpu.memory_space<smem>>
    %c0_i32_164 = arith.constant 0 : i32
    %484 = arith.addi %479, %c0_i32_164 : i32
    %485 = arith.index_cast %484 : i32 to index
    %486 = memref.load %arg2[%485] : memref<40xi32, #tpu.memory_space<smem>>
    %487 = arith.index_cast %483 : i32 to index
    %c0_165 = arith.constant 0 : index
    %488 = vector.load %arg4[%487, %c0_165] : memref<22x128xf32, #tpu.memory_space<vmem>>, vector<1x128xf32>
    %489 = arith.index_cast %486 : i32 to index
    %c0_166 = arith.constant 0 : index
    %490 = vector.load %arg5[%489, %c0_166] : memref<10x128xf32, #tpu.memory_space<vmem>>, vector<1x128xf32>
    %491 = arith.mulf %488, %490 : vector<1x128xf32>
    %492 = arith.addf %480, %491 : vector<1x128xf32>
    %c1_i32_167 = arith.constant 1 : i32
    %493 = arith.addi %479, %c1_i32_167 : i32
    %494 = arith.index_cast %493 : i32 to index
    %495 = memref.load %arg1[%494] : memref<40xi32, #tpu.memory_space<smem>>
    %c1_i32_168 = arith.constant 1 : i32
    %496 = arith.addi %479, %c1_i32_168 : i32
    %497 = arith.index_cast %496 : i32 to index
    %498 = memref.load %arg2[%497] : memref<40xi32, #tpu.memory_space<smem>>
    %499 = arith.index_cast %495 : i32 to index
    %c0_169 = arith.constant 0 : index
    %500 = vector.load %arg4[%499, %c0_169] : memref<22x128xf32, #tpu.memory_space<vmem>>, vector<1x128xf32>
    %501 = arith.index_cast %498 : i32 to index
    %c0_170 = arith.constant 0 : index
    %502 = vector.load %arg5[%501, %c0_170] : memref<10x128xf32, #tpu.memory_space<vmem>>, vector<1x128xf32>
    %503 = arith.mulf %500, %502 : vector<1x128xf32>
    %504 = arith.addf %492, %503 : vector<1x128xf32>
    %c2_i32_171 = arith.constant 2 : i32
    %505 = arith.addi %479, %c2_i32_171 : i32
    %506 = arith.index_cast %505 : i32 to index
    %507 = memref.load %arg1[%506] : memref<40xi32, #tpu.memory_space<smem>>
    %c2_i32_172 = arith.constant 2 : i32
    %508 = arith.addi %479, %c2_i32_172 : i32
    %509 = arith.index_cast %508 : i32 to index
    %510 = memref.load %arg2[%509] : memref<40xi32, #tpu.memory_space<smem>>
    %511 = arith.index_cast %507 : i32 to index
    %c0_173 = arith.constant 0 : index
    %512 = vector.load %arg4[%511, %c0_173] : memref<22x128xf32, #tpu.memory_space<vmem>>, vector<1x128xf32>
    %513 = arith.index_cast %510 : i32 to index
    %c0_174 = arith.constant 0 : index
    %514 = vector.load %arg5[%513, %c0_174] : memref<10x128xf32, #tpu.memory_space<vmem>>, vector<1x128xf32>
    %515 = arith.mulf %512, %514 : vector<1x128xf32>
    %516 = arith.addf %504, %515 : vector<1x128xf32>
    %c3_i32_175 = arith.constant 3 : i32
    %517 = arith.addi %479, %c3_i32_175 : i32
    %518 = arith.index_cast %517 : i32 to index
    %519 = memref.load %arg1[%518] : memref<40xi32, #tpu.memory_space<smem>>
    %c3_i32_176 = arith.constant 3 : i32
    %520 = arith.addi %479, %c3_i32_176 : i32
    %521 = arith.index_cast %520 : i32 to index
    %522 = memref.load %arg2[%521] : memref<40xi32, #tpu.memory_space<smem>>
    %523 = arith.index_cast %519 : i32 to index
    %c0_177 = arith.constant 0 : index
    %524 = vector.load %arg4[%523, %c0_177] : memref<22x128xf32, #tpu.memory_space<vmem>>, vector<1x128xf32>
    %525 = arith.index_cast %522 : i32 to index
    %c0_178 = arith.constant 0 : index
    %526 = vector.load %arg5[%525, %c0_178] : memref<10x128xf32, #tpu.memory_space<vmem>>, vector<1x128xf32>
    %527 = arith.mulf %524, %526 : vector<1x128xf32>
    %528 = arith.addf %516, %527 : vector<1x128xf32>
    %c4_i32_179 = arith.constant 4 : i32
    %529 = arith.addi %479, %c4_i32_179 : i32
    %530 = arith.index_cast %529 : i32 to index
    %531 = memref.load %arg1[%530] : memref<40xi32, #tpu.memory_space<smem>>
    %c4_i32_180 = arith.constant 4 : i32
    %532 = arith.addi %479, %c4_i32_180 : i32
    %533 = arith.index_cast %532 : i32 to index
    %534 = memref.load %arg2[%533] : memref<40xi32, #tpu.memory_space<smem>>
    %535 = arith.index_cast %531 : i32 to index
    %c0_181 = arith.constant 0 : index
    %536 = vector.load %arg4[%535, %c0_181] : memref<22x128xf32, #tpu.memory_space<vmem>>, vector<1x128xf32>
    %537 = arith.index_cast %534 : i32 to index
    %c0_182 = arith.constant 0 : index
    %538 = vector.load %arg5[%537, %c0_182] : memref<10x128xf32, #tpu.memory_space<vmem>>, vector<1x128xf32>
    %539 = arith.mulf %536, %538 : vector<1x128xf32>
    %540 = arith.addf %528, %539 : vector<1x128xf32>
    %541 = arith.index_cast %478 : i32 to index
    %542 = memref.load %arg3[%541] : memref<8xi32, #tpu.memory_space<smem>>
    %543 = arith.index_cast %542 : i32 to index
    %c0_183 = arith.constant 0 : index
    %544 = vector.load %arg6[%543, %c0_183] : memref<20x128xf32, #tpu.memory_space<vmem>>, vector<1x128xf32>
    %545 = arith.addf %540, %544 : vector<1x128xf32>
    %546 = tpu.concatenate %69, %137, %205, %273, %341, %409, %477, %545 in 0 : vector<1x128xf32>, vector<1x128xf32>, vector<1x128xf32>, vector<1x128xf32>, vector<1x128xf32>, vector<1x128xf32>, vector<1x128xf32>, vector<1x128xf32> -> vector<8x128xf32>
    %547 = vector.broadcast %1 : vector<1x128xf32> to vector<8x128xf32>
    %548 = arith.addf %546, %547 : vector<8x128xf32>
    %c0_184 = arith.constant 0 : index
    %c0_185 = arith.constant 0 : index
    %549 = vector.load %arg8[%c0_184, %c0_185] : memref<8x128xf32, #tpu.memory_space<vmem>>, vector<8x128xf32>
    tpu.vector_store %arg8[%c0_184, %c0_185], %548 {strides = array<i32>} : memref<8x128xf32, #tpu.memory_space<vmem>>, vector<8x128xf32>,
    return
  }
  func.func @transform_0(%arg0: i32) -> i32 {
    %c0_i32 = arith.constant 0 : i32
    %c0_i32_0 = arith.constant 0 : i32
    return %c0_i32 : i32
  }
  func.func @transform_1(%arg0: i32) -> i32 {
    %c0_i32 = arith.constant 0 : i32
    %c0_i32_0 = arith.constant 0 : i32
    return %c0_i32 : i32
  }
  func.func @transform_2(%arg0: i32) -> i32 {
    %c0_i32 = arith.constant 0 : i32
    %c0_i32_0 = arith.constant 0 : i32
    return %c0_i32 : i32
  }
  func.func @transform_3(%arg0: i32) -> (i32, i32) {
    %c0_i32 = arith.constant 0 : i32
    %c0_i32_0 = arith.constant 0 : i32
    %c0_i32_1 = arith.constant 0 : i32
    return %c0_i32, %c0_i32_0 : i32, i32
  }
  func.func @transform_4(%arg0: i32) -> (i32, i32) {
    %c0_i32 = arith.constant 0 : i32
    %c0_i32_0 = arith.constant 0 : i32
    %c0_i32_1 = arith.constant 0 : i32
    return %c0_i32, %c0_i32_0 : i32, i32
  }
  func.func @transform_5(%arg0: i32) -> (i32, i32) {
    %c0_i32 = arith.constant 0 : i32
    %c0_i32_0 = arith.constant 0 : i32
    %c0_i32_1 = arith.constant 0 : i32
    return %c0_i32, %c0_i32_0 : i32, i32
  }
  func.func @transform_6(%arg0: i32) -> (i32, i32) {
    %c0_i32 = arith.constant 0 : i32
    %c0_i32_0 = arith.constant 0 : i32
    %c0_i32_1 = arith.constant 0 : i32
    return %c0_i32, %c0_i32_0 : i32, i32
  }
  func.func @transform_7(%arg0: i32) -> (i32, i32) {
    %c0_i32 = arith.constant 0 : i32
    %c0_i32_0 = arith.constant 0 : i32
    return %arg0, %c0_i32 : i32, i32
  }
}

</mosaic_0001>

<bundles_post_ra>
// kernel: features_linear_pallas.1
= control target key start
LH: loop header
LB: loop body
LE: loop exit
PB: predicated region body
PF: predicated region fallthrough
CT: control target
= control target key end

     0   :  { %s1237_s0 = inlined_call_operand.hbm [shape: s32[40], index: 0, kind: input, shape index: {}]   ;;  %s1238_s1 = inlined_call_operand.hbm [shape: s32[40], index: 1, kind: input, shape index: {}]   ;;  %s1239_s2 = inlined_call_operand.vmem [shape: s32[8], index: 2, kind: input, shape index: {}]   ;;  %s1240_s3 = inlined_call_operand.hbm [shape: f32[22,128], index: 3, kind: input, shape index: {}]   ;;  %s1241_s4 = inlined_call_operand.hbm [shape: f32[10,128], index: 4, kind: input, shape index: {}]   ;;  %s1242_s5 = inlined_call_operand.hbm [shape: f32[20,128], index: 5, kind: input, shape index: {}]   ;;  %s1243_s6 = inlined_call_operand.vmem [shape: f32[1,128], index: 6, kind: input, shape index: {}]   ;;  %s1244_s7 = inlined_call_operand.hbm [shape: f32[8,128], index: 7, kind: output, shape index: {}]  }
   0x1   :  { %1245 = sst [smem:[#allocation49_spill]] %s1243_s6 }
   0x2   :  { %1246 = sst [smem:[#allocation50_spill]] %s1244_s7 }
   0x3   :  { %12 = vsyncpa [#allocation5], 0 }
   0x4   :  { %13 = vsyncpa [#allocation8], 0 }
   0x5   :  { %14 = vsyncpa [#allocation6], 0 }
   0x6   :  { %15 = vsyncpa [#allocation3], 0 }
   0x7   :  { %16 = vsyncpa [#allocation12], 0 }
   0x8   :  { %17 = vsyncpa [#allocation4], 0  ;;  %s62_s26 = sshll.u32 %s1241_s4, 4  ;;  %s900_s27 = smov [#allocation11]   ;;  %s63_s26 = int_to_ptr.hbm [resolvable:$true] %s62_s26 }
   0x9   :  { %s64_s28 = sshll.u32 %s900_s27, 4  ;;  %s23_s8 = sshll.u32 %s1237_s0, 4  ;;  %s65_s28 = int_to_ptr.vmem [resolvable:$true] %s64_s28  ;;  %s24_s8 = int_to_ptr.hbm [resolvable:$true] %s23_s8 }
   0xa   :  { %s901_s9 = smov 128   ;;  %s902_s10 = smov 8  }
   0xb   :  { %70 = dma.hbm_to_vmem [thread:$0]  %s63_s26, 256, %s65_s28, [#allocation12], %s901_s9, %s901_s9, %s902_s10  }
   0xc   :  { %s903_s11 = smov [#allocation2]   ;;  %s32_s14 = sshll.u32 %s1238_s1, 4  ;;  %s33_s14 = int_to_ptr.hbm [resolvable:$true] %s32_s14 }
   0xd   :  { %26 = dma.hbm_to_smem %s24_s8, 16, %s903_s11, [#allocation5]  }
   0xe   :  { %s41_s16 = sshll.u32 %s1239_s2, 4  ;;  %s904_s17 = smov [#allocation7]   ;;  %s42_s16 = int_to_ptr.vmem [resolvable:$true] %s41_s16 }
   0xf   :  { %35 = dma.hbm_to_smem %s33_s14, 16, %s904_s17, [#allocation8]  }
  0x10   :  { %s905_s18 = smov [#allocation9]   ;;  %s49_s20 = sshll.u32 %s1240_s3, 4  ;;  %s50_s20 = int_to_ptr.hbm [resolvable:$true] %s49_s20 }
  0x11   :  { %44 = dma.vmem_to_smem %s42_s16, 16, %s905_s18, [#allocation6]  }
  0x12   :  { %s906_s21 = smov [#allocation10]   ;;  %s75_s24 = sshll.u32 %s1242_s5, 4  ;;  %s76_s24 = int_to_ptr.hbm [resolvable:$true] %s75_s24 }
  0x13   :  { %s51_s22 = sshll.u32 %s906_s21, 4  ;;  %s907_s2 = smov [#allocation13]   ;;  %s52_s22 = int_to_ptr.vmem [resolvable:$true] %s51_s22 }
  0x14   :  { %57 = dma.hbm_to_vmem [thread:$0]  %s50_s20, 384, %s52_s22, [#allocation3], %s901_s9, %s901_s9, %s902_s10  }
  0x15   :  { %s77_s25 = sshll.u32 %s907_s2, 4  ;;  %s78_s25 = int_to_ptr.vmem [resolvable:$true] %s77_s25 }
  0x16   :  { %83 = dma.hbm_to_vmem [thread:$0]  %s76_s24, 384, %s78_s25, [#allocation12], %s901_s9, %s901_s9, %s902_s10  }
  0x17   :  { %888 = dma.done.wait [#allocation5], 16  }
  0x18   :  { %889 = vsyncadd [#allocation5], 4294967280 }
  0x19   :  { %890 = dma.done.wait [#allocation8], 16  }
  0x1a   :  { %891 = vsyncadd [#allocation8], 4294967280 }
  0x1b   :  { %892 = dma.done.wait [#allocation6], 16  }
  0x1c   :  { %893 = vsyncadd [#allocation6], 4294967280 }
  0x1d   :  { %894 = dma.done.wait [#allocation3], 384  }
  0x1e   :  { %895 = vsyncadd [#allocation3], 4294966912 }
  0x1f   :  { %896 = dma.done.wait [#allocation12], 640  }
  0x20   :  { %897 = vsyncadd [#allocation12], 4294966656 }
  0x21   :  { %110 = sfence }
  0x22   :  { %s967_s3 = sld [smem:[#allocation2]]  ;;  %vm533_vm0 = vcmask 1040384   ;;  %vm535_vm1 = vcmask 1041408   ;;  %vm537_vm2 = vcmask 1042432   ;;  %vm539_vm3 = vcmask 1043456  }
  0x23   :  { %s969_s5 = sld [smem:[#allocation7]]  ;;  %vm541_vm4 = vcmask 1044480   ;;  %vm543_vm5 = vcmask 1045504   ;;  %vm545_vm6 = vcmask 1046528  }
  0x24   :  { %s971_s26 = sld [smem:[#allocation2 + $0x1]] }
  0x25   :  { %s973_s27 = sld [smem:[#allocation7 + $0x1]] }
  0x26   :  { %s975_s28 = sld [smem:[#allocation2 + $0x2]] }
  0x27   :  { %s977_s29 = sld [smem:[#allocation7 + $0x2]] }
  0x28   :  { %s979_s30 = sld [smem:[#allocation2 + $0x3]] }
  0x29   :  { %s981_s8 = sld [smem:[#allocation7 + $0x3]] }
  0x2a   :  { %s983_s9 = sld [smem:[#allocation2 + $0x4]] }
  0x2b   :  { %s985_s10 = sld [smem:[#allocation7 + $0x4]] }
  0x2c   :  { %s987_s11 = sld [smem:[#allocation9]] }
  0x2d   :  { %s989_s12 = sld [smem:[#allocation2 + $0x5]] }
  0x2e   :  { %1247 = sst [smem:[#allocation21_spill]] %s979_s30 }
  0x2f   :  { %1248 = sst [smem:[#allocation22_spill]] %s981_s8 }
  0x30   :  { %1249 = sst [smem:[#allocation23_spill]] %s983_s9 }
  0x31   :  { %1250 = sst [smem:[#allocation24_spill]] %s985_s10 }
  0x32   :  { %1251 = sst [smem:[#allocation25_spill]] %s987_s11 }
  0x33   :  { %s991_s13 = sld [smem:[#allocation7 + $0x5]] }
  0x34   :  { %s993_s14 = sld [smem:[#allocation2 + $0x6]] }
  0x35   :  { %s995_s4 = sld [smem:[#allocation7 + $0x6]] }
  0x36   :  { %s997_s15 = sld [smem:[#allocation2 + $0x7]] }
  0x37   :  { %s999_s16 = sld [smem:[#allocation7 + $0x7]] }
  0x38   :  { %s1001_s17 = sld [smem:[#allocation2 + $0x8]] }
  0x39   :  { %s1003_s18 = sld [smem:[#allocation7 + $0x8]] }
  0x3a   :  { %s1005_s0 = sld [smem:[#allocation2 + $0x9]] }
  0x3b   :  { %s1007_s19 = sld [smem:[#allocation7 + $0x9]] }
  0x3c   :  { %s1009_s20 = sld [smem:[#allocation9 + $0x1]] }
  0x3d   :  { %s1011_s21 = sld [smem:[#allocation2 + $0xa]] }
  0x3e   :  { %s1013_s22 = sld [smem:[#allocation7 + $0xa]] }
  0x3f   :  { %1252 = sst [smem:[#allocation26_spill]] %s1003_s18 }
  0x40   :  { %1253 = sst [smem:[#allocation27_spill]] %s1005_s0 }
  0x41   :  { %1254 = sst [smem:[#allocation28_spill]] %s1007_s19 }
  0x42   :  { %1255 = sst [smem:[#allocation29_spill]] %s1009_s20 }
  0x43   :  { %s1015_s23 = sld [smem:[#allocation2 + $0xb]] }
  0x44   :  { %s1017_s1 = sld [smem:[#allocation7 + $0xb]] }
  0x45   :  { %s1019_s24 = sld [smem:[#allocation2 + $0xc]] }
  0x46   :  { %s1021_s2 = sld [smem:[#allocation7 + $0xc]] }
  0x47   :  { %s1023_s25 = sld [smem:[#allocation2 + $0xd]] }
  0x48   :  { %s1025_s7 = sld [smem:[#allocation7 + $0xd]] }
  0x49   :  { %s1027_s6 = sld [smem:[#allocation2 + $0xe]] }
  0x4a   :  { %s1029_s11 = sld [smem:[#allocation7 + $0xe]] }
  0x4b   :  { %s1031_s20 = sld [smem:[#allocation9 + $0x2]] }
  0x4c   :  { %s1033_s10 = sld [smem:[#allocation2 + $0xf]] }
  0x4d   :  { %1256 = sst [smem:[#allocation30_spill]] %s1023_s25 }
  0x4e   :  { %1257 = sst [smem:[#allocation31_spill]] %s1025_s7 }
  0x4f   :  { %1258 = sst [smem:[#allocation32_spill]] %s1027_s6 }
  0x50   :  { %1259 = sst [smem:[#allocation33_spill]] %s1029_s11 }
  0x51   :  { %1260 = sst [smem:[#allocation34_spill]] %s1031_s20 }
  0x52   :  { %s1035_s9 = sld [smem:[#allocation7 + $0xf]] }
  0x53   :  { %s1037_s19 = sld [smem:[#allocation2 + $0x10]] }
  0x54   :  { %s1039_s0 = sld [smem:[#allocation7 + $0x10]] }
  0x55   :  { %s1041_s8 = sld [smem:[#allocation2 + $0x11]] }
  0x56   :  { %s1043_s25 = sld [smem:[#allocation7 + $0x11]] }
  0x57   :  { %s1045_s7 = sld [smem:[#allocation2 + $0x12]] }
  0x58   :  { %s1047_s6 = sld [smem:[#allocation7 + $0x12]] }
  0x59   :  { %s1049_s20 = sld [smem:[#allocation2 + $0x13]] }
  0x5a   :  { %1261 = sst [smem:[#allocation35_spill]] %s1039_s0 }
  0x5b   :  { %1262 = sst [smem:[#allocation36_spill]] %s1041_s8 }
  0x5c   :  { %1263 = sst [smem:[#allocation37_spill]] %s1043_s25 }
  0x5d   :  { %1264 = sst [smem:[#allocation38_spill]] %s1045_s7 }
  0x5e   :  { %1265 = sst [smem:[#allocation39_spill]] %s1047_s6 }
  0x5f   :  { %1266 = sst [smem:[#allocation40_spill]] %s1049_s20 }
  0x60   :  { %s1051_s11 = sld [smem:[#allocation7 + $0x13]] }
  0x61   :  { %s1053_s30 = sld [smem:[#allocation9 + $0x3]] }
  0x62   :  { %s1055_s18 = sld [smem:[#allocation2 + $0x14]] }
  0x63   :  { %s1057_s0 = sld [smem:[#allocation7 + $0x14]] }
  0x64   :  { %s1059_s8 = sld [smem:[#allocation2 + $0x15]] }
  0x65   :  { %s1061_s25 = sld [smem:[#allocation7 + $0x15]] }
  0x66   :  { %1267 = sst [smem:[#allocation41_spill]] %s1051_s11  ;;  %s166_s11 = scalar_lea.vmem [#allocation10], %s989_s12 }
  0x67   :  { %1268 = sst [smem:[#allocation42_spill]] %s1053_s30  ;;  %v167_v0 = vld [vmem:[%s166_s11] sm:$0x1]  ;;  %s168_s30 = scalar_lea.vmem [#allocation11], %s991_s13 }
  0x68   :  { %s1063_s7 = sld [smem:[#allocation2 + $0x16]]  ;;  %v169_v1 = vld [vmem:[%s168_s30] sm:$0x1]  ;;  %s118_s11 = scalar_lea.vmem [#allocation11], %s969_s5 }
  0x69   :  { %1269 = sst [smem:[#allocation43_spill]] %s1057_s0  ;;  %v119_v5 = vld [vmem:[%s118_s11] sm:$0x1]  ;;  %s125_s30 = scalar_lea.vmem [#allocation10], %s971_s26  ;;  %v170_v13 = vmul.f32 %v169_v1, %v167_v0 }
  0x6a   :  { %1270 = sst [smem:[#allocation44_spill]] %s1059_s8  ;;  %s175_s8 = scalar_lea.vmem [#allocation10], %s993_s14  ;;  %v126_v6 = vld [vmem:[%s125_s30] sm:$0x1] }
  0x6b   :  { %1271 = sst [smem:[#allocation45_spill]] %s1061_s25  ;;  %v176_v2 = vld [vmem:[%s175_s8] sm:$0x1]  ;;  %s127_s12 = scalar_lea.vmem [#allocation11], %s973_s27 }
  0x6c   :  { %s1065_s6 = sld [smem:[#allocation7 + $0x16]]  ;;  %v128_v7 = vld [vmem:[%s127_s12] sm:$0x1]  ;;  %s216_s13 = scalar_lea.vmem [#allocation10], %s1011_s21 }
  0x6d   :  { %s1067_s20 = sld [smem:[#allocation2 + $0x17]]  ;;  %v217_v8 = vld [vmem:[%s216_s13] sm:$0x1]  ;;  %s218_s8 = scalar_lea.vmem [#allocation11], %s1013_s22  ;;  %v129_v24 = vmul.f32 %v128_v7, %v126_v6 }
  0x6e   :  { %1272 = sst [smem:[#allocation46_spill]] %s1063_s7  ;;  %s177_s7 = scalar_lea.vmem [#allocation11], %s995_s4  ;;  %v219_v9 = vld [vmem:[%s218_s8] sm:$0x1] }
  0x6f   :  { %s1071_s0 = sld [smem:[#allocation7 + $0x17]]  ;;  %v178_v3 = vld [vmem:[%s177_s7] sm:$0x1]  ;;  %s184_s14 = scalar_lea.vmem [#allocation10], %s997_s15  ;;  %v220_v27 = vmul.f32 %v219_v9, %v217_v8 }
  0x70   :  { %s1074_s25 = sld [smem:[#allocation2 + $0x18]]  ;;  %v185_v10 = vld [vmem:[%s184_s14] sm:$0x1]  ;;  %s225_s5 = scalar_lea.vmem [#allocation10], %s1015_s23  ;;  %v179_v14 = vmul.f32 %v178_v3, %v176_v2 }
  0x71   :  { %s1085_s7 = sld [smem:[#allocation9 + $0x4]]  ;;  %v226_v12 = vld [vmem:[%s225_s5] sm:$0x1]  ;;  %s227_s27 = scalar_lea.vmem [#allocation11], %s1017_s1 }
  0x72   :  { %1273 = sst [smem:[#allocation47_spill]] %s1065_s6  ;;  %v228_v15 = vld [vmem:[%s227_s27] sm:$0x1]  ;;  %s268_s15 = scalar_lea.vmem [#allocation11], %s1035_s9  ;;  %v180_v30 = vadd.f32 %v179_v14, %v170_v13 }
  0x73   :  { %1274 = sst [smem:[#allocation48_spill]] %s1067_s20  ;;  %s116_s20 = scalar_lea.vmem [#allocation10], %s967_s3  ;;  %v269_v17 = vld [vmem:[%s268_s15] sm:$0x1]  ;;  %v229_v28 = vmul.f32 %v228_v15, %v226_v12 }
  0x74   :  { %s1077_s6 = sld [smem:[#allocation7 + $0x18]]  ;;  %v117_v4 = vld [vmem:[%s116_s20] sm:$0x1]  ;;  %s186_s3 = scalar_lea.vmem [#allocation11], %s999_s16 }
  0x75   :  { %v187_v11 = vld [vmem:[%s186_s3] sm:$0x1]  ;;  %s1090_s26 = sld [smem:[#allocation2 + $0x19]]  ;;  %s266_s20 = scalar_lea.vmem [#allocation10], %s1033_s10  ;;  %v120_v23 = vmul.f32 %v119_v5, %v117_v4  ;;  %v230_v48 = vadd.f32 %v229_v28, %v220_v27 }
  0x76   :  { %s1093_s4 = sld [smem:[#allocation7 + $0x19]]  ;;  %v267_v16 = vld [vmem:[%s266_s20] sm:$0x1]  ;;  %s134_s22 = scalar_lea.vmem [#allocation10], %s975_s28  ;;  %v188_v31 = vmul.f32 %v187_v11, %v185_v10 }
  0x77   :  { %s1097_s16 = sld [smem:[#allocation2 + $0x1a]]  ;;  %v135_v18 = vld [vmem:[%s134_s22] sm:$0x1]  ;;  %s136_s23 = scalar_lea.vmem [#allocation11], %s977_s29  ;;  %v270_v41 = vmul.f32 %v269_v17, %v267_v16  ;;  %v130_v44 = vadd.f32 %v129_v24, %v120_v23 }
  0x78   :  { %s1275_s21 = sld [smem:[#allocation26_spill]]  ;;  %v137_v19 = vld [vmem:[%s136_s23] sm:$0x1]  ;;  %s234_s30 = scalar_lea.vmem [#allocation10], %s1019_s24  ;;  %v189_v52 = vadd.f32 %v188_v31, %v180_v30 }
  0x79   :  { %s1276_s11 = sld [smem:[#allocation35_spill]]  ;;  %v235_v20 = vld [vmem:[%s234_s30] sm:$0x1]  ;;  %s236_s1 = scalar_lea.vmem [#allocation11], %s1021_s2  ;;  %v138_v45 = vmul.f32 %v137_v19, %v135_v18 }
  0x7a   :  { %v237_v21 = vld [vmem:[%s236_s1] sm:$0x1]  ;;  %s275_s12 = scalar_lea.vmem [#allocation10], %s1037_s19  ;;  %s1104_s10 = sld [smem:[#allocation7 + $0x1a]] }
  0x7b   :  { %v276_v22 = vld [vmem:[%s275_s12] sm:$0x1]  ;;  %s1277_s9 = sld [smem:[#allocation43_spill]]  ;;  %s193_s13 = scalar_lea.vmem [#allocation10], %s1001_s17  ;;  %v238_v49 = vmul.f32 %v237_v21, %v235_v20  ;;  %v139_v1 = vadd.f32 %v138_v45, %v130_v44 }
  0x7c   :  { %s1278_s8 = sld [smem:[#allocation36_spill]]  ;;  %v194_v25 = vld [vmem:[%s193_s13] sm:$0x1]  ;;  %s316_s5 = scalar_lea.vmem [#allocation10], %s1055_s18 }
  0x7d   :  { %s1279_s14 = sld [smem:[#allocation37_spill]]  ;;  %v317_v32 = vld [vmem:[%s316_s5] sm:$0x1]  ;;  %s366_s5 = scalar_lea.vmem [#allocation10], %s1090_s26  ;;  %v239_v5 = vadd.f32 %v238_v49, %v230_v48 }
  0x7e   :  { %s195_s28 = scalar_lea.vmem [#allocation11], %s1275_s21  ;;  %s1280_s29 = sld [smem:[#allocation44_spill]]  ;;  %v367_v50 = vld [vmem:[%s366_s5] sm:$0x1] }
  0x7f   :  { %v196_v26 = vld [vmem:[%s195_s28] sm:$0x1]  ;;  %s277_s24 = scalar_lea.vmem [#allocation11], %s1276_s11  ;;  %s1281_s2 = sld [smem:[#allocation21_spill]] }
  0x80   :  { %v278_v29 = vld [vmem:[%s277_s24] sm:$0x1]  ;;  %s1109_s19 = sld [smem:[#allocation2 + $0x1b]]  ;;  %v197_v53 = vmul.f32 %v196_v26, %v194_v25 }
  0x81   :  { %s1282_s3 = sld [smem:[#allocation22_spill]]  ;;  %s318_s17 = scalar_lea.vmem [#allocation11], %s1277_s9  ;;  %v279_v42 = vmul.f32 %v278_v29, %v276_v22 }
  0x82   :  { %s1283_s27 = sld [smem:[#allocation30_spill]]  ;;  %v319_v33 = vld [vmem:[%s318_s17] sm:$0x1]  ;;  %s284_s21 = scalar_lea.vmem [#allocation10], %s1278_s8  ;;  %v198_v8 = vadd.f32 %v197_v53, %v189_v52 }
  0x83   :  { %s1284_s20 = sld [smem:[#allocation31_spill]]  ;;  %v285_v34 = vld [vmem:[%s284_s21] sm:$0x1]  ;;  %s286_s23 = scalar_lea.vmem [#allocation11], %s1279_s14  ;;  %v320_v57 = vmul.f32 %v319_v33, %v317_v32  ;;  %v280_v62 = vadd.f32 %v279_v42, %v270_v41 }
  0x84   :  { %s1113_s15 = sld [smem:[#allocation7 + $0x1b]]  ;;  %v287_v35 = vld [vmem:[%s286_s23] sm:$0x1]  ;;  %s325_s11 = scalar_lea.vmem [#allocation10], %s1280_s29 }
  0x85   :  { %s1285_s22 = sld [smem:[#allocation45_spill]]  ;;  %v326_v36 = vld [vmem:[%s325_s11] sm:$0x1]  ;;  %s143_s12 = scalar_lea.vmem [#allocation10], %s1281_s2  ;;  %v288_v63 = vmul.f32 %v287_v35, %v285_v34 }
  0x86   :  { %s1118_s30 = sld [smem:[#allocation2 + $0x1c]]  ;;  %v144_v37 = vld [vmem:[%s143_s12] sm:$0x1]  ;;  %s375_s23 = scalar_lea.vmem [#allocation10], %s1097_s16 }
  0x87   :  { %s1286_s1 = sld [smem:[#allocation27_spill]]  ;;  %s145_s13 = scalar_lea.vmem [#allocation11], %s1282_s3  ;;  %v376_v55 = vld [vmem:[%s375_s23] sm:$0x1]  ;;  %v289_v19 = vadd.f32 %v288_v63, %v280_v62 }
  0x88   :  { %s1287_s18 = sld [smem:[#allocation28_spill]]  ;;  %v146_v38 = vld [vmem:[%s145_s13] sm:$0x1]  ;;  %s243_s9 = scalar_lea.vmem [#allocation10], %s1283_s27 }
  0x89   :  { %v244_v39 = vld [vmem:[%s243_s9] sm:$0x1]  ;;  %s245_s28 = scalar_lea.vmem [#allocation11], %s1284_s20  ;;  %s1125_s14 = sld [smem:[#allocation7 + $0x1c]]  ;;  %v147_v2 = vmul.f32 %v146_v38, %v144_v37 }
  0x8a   :  { %v246_v40 = vld [vmem:[%s245_s28] sm:$0x1]  ;;  %s1288_s29 = sld [smem:[#allocation46_spill]]  ;;  %s368_s27 = scalar_lea.vmem [#allocation11], %s1093_s4 }
  0x8b   :  { %s327_s8 = scalar_lea.vmem [#allocation11], %s1285_s22  ;;  %s1289_s3 = sld [smem:[#allocation38_spill]]  ;;  %v369_v51 = vld [vmem:[%s368_s27] sm:$0x1]  ;;  %v247_v6 = vmul.f32 %v246_v40, %v244_v39  ;;  %v148_v22 = vadd.f32 %v147_v2, %v139_v1 }
  0x8c   :  { %v328_v43 = vld [vmem:[%s327_s8] sm:$0x1]  ;;  %s1290_s17 = sld [smem:[#allocation32_spill]]  ;;  %s377_s4 = scalar_lea.vmem [#allocation11], %s1104_s10  ;;  %v370_v11 = vmul.f32 %v369_v51, %v367_v50 }
  0x8d   :  { %s202_s24 = scalar_lea.vmem [#allocation10], %s1286_s1  ;;  %s1131_s20 = sld [smem:[#allocation2 + $0x1d]]  ;;  %v329_v58 = vmul.f32 %v328_v43, %v326_v36  ;;  %v378_v59 = vld [vmem:[%s377_s4] sm:$0x1]  ;;  %v248_v24 = vadd.f32 %v247_v6, %v239_v5 }
  0x8e   :  { %v203_v46 = vld [vmem:[%s202_s24] sm:$0x1]  ;;  %s204_s2 = scalar_lea.vmem [#allocation11], %s1287_s18  ;;  %s1291_s21 = sld [smem:[#allocation33_spill]]  ;;  %v379_v12 = vmul.f32 %v378_v59, %v376_v55 }
  0x8f   :  { %v205_v47 = vld [vmem:[%s204_s2] sm:$0x1]  ;;  %s1292_s11 = sld [smem:[#allocation47_spill]]  ;;  %v330_v16 = vadd.f32 %v329_v58, %v320_v57  ;;  %s386_s4 = scalar_lea.vmem [#allocation11], %s1113_s15 }
  0x90   :  { %s334_s22 = scalar_lea.vmem [#allocation10], %s1288_s29  ;;  %s1135_s1 = sld [smem:[#allocation7 + $0x1d]]  ;;  %v206_v9 = vmul.f32 %v205_v47, %v203_v46  ;;  %v387_v18 = vld [vmem:[%s386_s4] sm:$0x1]  ;;  %v380_v31 = vadd.f32 %v379_v12, %v370_v11 }
  0x91   :  { %v335_v54 = vld [vmem:[%s334_s22] sm:$0x1]  ;;  %s293_s12 = scalar_lea.vmem [#allocation10], %s1289_s3  ;;  %s1293_s26 = sld [smem:[#allocation23_spill]] }
  0x92   :  { %v294_v56 = vld [vmem:[%s293_s12] sm:$0x1]  ;;  %s1294_s18 = sld [smem:[#allocation24_spill]]  ;;  %s252_s9 = scalar_lea.vmem [#allocation10], %s1290_s17  ;;  %v207_v28 = vadd.f32 %v206_v9, %v198_v8 }
  0x93   :  { %s1139_s13 = sld [smem:[#allocation9 + $0x5]]  ;;  %v253_v60 = vld [vmem:[%s252_s9] sm:$0x1]  ;;  %s384_s22 = scalar_lea.vmem [#allocation10], %s1109_s19 }
  0x94   :  { %s1295_s28 = sld [smem:[#allocation39_spill]]  ;;  %s254_s8 = scalar_lea.vmem [#allocation11], %s1291_s21  ;;  %v385_v13 = vld [vmem:[%s384_s22] sm:$0x1] }
  0x95   :  { %v255_v61 = vld [vmem:[%s254_s8] sm:$0x1]  ;;  %s336_s16 = scalar_lea.vmem [#allocation11], %s1292_s11  ;;  %s1296_s29 = sld [smem:[#allocation48_spill]]  ;;  %v388_v32 = vmul.f32 %v387_v18, %v385_v13 }
  0x96   :  { %v337_v0 = vld [vmem:[%s336_s16] sm:$0x1]  ;;  %s1144_s24 = sld [smem:[#allocation2 + $0x1e]]  ;;  %s345_s19 = scalar_lea.vmem [#allocation11], %s1071_s0  ;;  %v256_v25 = vmul.f32 %v255_v61, %v253_v60 }
  0x97   :  { %s152_s10 = scalar_lea.vmem [#allocation10], %s1293_s26  ;;  %s1297_s3 = sld [smem:[#allocation40_spill]]  ;;  %v338_v17 = vmul.f32 %v337_v0, %v335_v54  ;;  %v346_v21 = vld [vmem:[%s345_s19] sm:$0x1]  ;;  %v389_v49 = vadd.f32 %v388_v32, %v380_v31 }
  0x98   :  { %v153_v3 = vld [vmem:[%s152_s10] sm:$0x1]  ;;  %s154_s2 = scalar_lea.vmem [#allocation11], %s1294_s18  ;;  %s1298_s5 = sld [smem:[#allocation41_spill]]  ;;  %v257_v42 = vadd.f32 %v256_v25, %v248_v24 }
  0x99   :  { %v155_v4 = vld [vmem:[%s154_s2] sm:$0x1]  ;;  %s1149_s17 = sld [smem:[#allocation7 + $0x1e]]  ;;  %s393_s8 = scalar_lea.vmem [#allocation10], %s1118_s30  ;;  %v339_v34 = vadd.f32 %v338_v17, %v330_v16 }
  0x9a   :  { %s295_s27 = scalar_lea.vmem [#allocation11], %s1295_s28  ;;  %s1153_s23 = sld [smem:[#allocation2 + $0x1f]]  ;;  %v394_v26 = vld [vmem:[%s393_s8] sm:$0x1]  ;;  %v156_v27 = vmul.f32 %v155_v4, %v153_v3 }
  0x9b   :  { %v296_v7 = vld [vmem:[%s295_s27] sm:$0x1]  ;;  %s343_s21 = scalar_lea.vmem [#allocation10], %s1296_s29  ;;  %s1299_s11 = sld [smem:[#allocation29_spill]] }
  0x9c   :  { %v344_v10 = vld [vmem:[%s343_s21] sm:$0x1]  ;;  %s1158_s18 = sld [smem:[#allocation7 + $0x1f]]  ;;  %v297_v20 = vmul.f32 %v296_v7, %v294_v56  ;;  %s352_s29 = scalar_lea.vmem [#allocation10], %s1074_s25  ;;  %v157_v47 = vadd.f32 %v156_v27, %v148_v22 }
  0x9d   :  { %s302_s12 = scalar_lea.vmem [#allocation10], %s1297_s3  ;;  %s1161_s9 = sld [smem:[#allocation2 + $0x20]]  ;;  %v353_v29 = vld [vmem:[%s352_s29] sm:$0x1]  ;;  %v347_v35 = vmul.f32 %v346_v21, %v344_v10 }
  0x9e   :  { %v303_v14 = vld [vmem:[%s302_s12] sm:$0x1]  ;;  %s304_s26 = scalar_lea.vmem [#allocation11], %s1298_s5  ;;  %s1165_s15 = sld [smem:[#allocation7 + $0x20]]  ;;  %v298_v38 = vadd.f32 %v297_v20, %v289_v19 }
  0x9f   :  { %v305_v15 = vld [vmem:[%s304_s26] sm:$0x1]  ;;  %s1300_s16 = sld [smem:[#allocation34_spill]]  ;;  %s354_s0 = scalar_lea.vmem [#allocation11], %s1077_s6  ;;  %v348_v53 = vadd.f32 %v347_v35, %v339_v34 }
  0xa0   :  { %v355_v30 = vld [vmem:[%s354_s0] sm:$0x1]  ;;  %s1301_s10 = sld [smem:[#allocation25_spill]]  ;;  %s395_s2 = scalar_lea.vmem [#allocation11], %s1125_s14  ;;  %v306_v39 = vmul.f32 %v305_v15, %v303_v14 }
  0xa1   :  { %s209_s28 = scalar_lea.vmem [#allocation13], %s1299_s11  ;;  %v396_v33 = vld [vmem:[%s395_s2] sm:$0x1]  ;;  %s1170_s3 = sld [smem:[#allocation2 + $0x21]]  ;;  %v356_v54 = vmul.f32 %v355_v30, %v353_v29 }
  0xa2   :  { %v210_v23 = vld [vmem:[%s209_s28] sm:$0x1]  ;;  %s416_s30 = scalar_lea.vmem [#allocation10], %s1144_s24  ;;  %s1173_s5 = sld [smem:[#allocation7 + $0x21]]  ;;  %v397_v50 = vmul.f32 %v396_v33, %v394_v26  ;;  %v307_v57 = vadd.f32 %v306_v39, %v298_v38 }
  0xa3   :  { %v417_v36 = vld [vmem:[%s416_s30] sm:$0x1]  ;;  %s418_s6 = scalar_lea.vmem [#allocation11], %s1149_s17  ;;  %s1177_s27 = sld [smem:[#allocation2 + $0x22]]  ;;  %v211_v48 = vadd.f32 %v210_v23, %v207_v28  ;;  %v357_v5 = vadd.f32 %v356_v54, %v348_v53 }
  0xa4   :  { %v419_v40 = vld [vmem:[%s418_s6] sm:$0x1]  ;;  %s1302_s21 = sld [smem:[#allocation42_spill]]  ;;  %s402_s22 = scalar_lea.vmem [#allocation10], %s1131_s20  ;;  %v398_v1 = vadd.f32 %v397_v50, %v389_v49 }
  0xa5   :  { %s259_s25 = scalar_lea.vmem [#allocation13], %s1300_s16  ;;  %v403_v43 = vld [vmem:[%s402_s22] sm:$0x1]  ;;  %s404_s24 = scalar_lea.vmem [#allocation11], %s1135_s1  ;;  %v420_v45 = vmul.f32 %v419_v40, %v417_v36  ;;  %v513_v4 = vrot.slane %v211_v48, 7 }
  0xa6   :  { %v260_v37 = vld [vmem:[%s259_s25] sm:$0x1]  ;;  %s159_s14 = scalar_lea.vmem [#allocation13], %s1301_s10  ;;  %s425_s11 = scalar_lea.vmem [#allocation10], %s1153_s23 }
  0xa7   :  { %v160_v41 = vld [vmem:[%s159_s14] sm:$0x1]  ;;  %s1183_s12 = sld [smem:[#allocation7 + $0x22]]  ;;  %s427_s17 = scalar_lea.vmem [#allocation11], %s1158_s18  ;;  %v261_v59 = vadd.f32 %v260_v37, %v257_v42 }
  0xa8   :  { %v405_v44 = vld [vmem:[%s404_s24] sm:$0x1]  ;;  %s1186_s26 = sld [smem:[#allocation9 + $0x6]]  ;;  %s434_s1 = scalar_lea.vmem [#allocation10], %s1161_s9  ;;  %v161_v63 = vadd.f32 %v160_v41, %v157_v47 }
  0xa9   :  { %v426_v46 = vld [vmem:[%s425_s11] sm:$0x1]  ;;  %s1190_s23 = sld [smem:[#allocation2 + $0x23]]  ;;  %s436_s4 = scalar_lea.vmem [#allocation11], %s1165_s15  ;;  %v406_v2 = vmul.f32 %v405_v44, %v403_v43  ;;  %v516_v14 = vrot.slane %v261_v59, 6 }
  0xaa   :  { %v428_v51 = vld [vmem:[%s427_s17] sm:$0x1]  ;;  %s309_s20 = scalar_lea.vmem [#allocation13], %s1302_s21  ;;  %s1193_s19 = sld [smem:[#allocation7 + $0x23]]  ;;  %v534_v17 = vsel %vm533_vm0, %v161_v63, %v513_v4 }
  0xab   :  { %v310_v52 = vld [vmem:[%s309_s20] sm:$0x1]  ;;  %v429_v55 = vmul.f32 %v428_v51, %v426_v46  ;;  %s443_s18 = scalar_lea.vmem [#allocation10], %s1170_s3  ;;  %s1196_s28 = sld [smem:[#allocation2 + $0x24]]  ;;  %v407_v15 = vadd.f32 %v406_v2, %v398_v1  ;;  %v536_v25 = vsel %vm535_vm1, %v534_v17, %v516_v14 }
  0xac   :  { %v435_v56 = vld [vmem:[%s434_s1] sm:$0x1]  ;;  %s359_s8 = scalar_lea.vmem [#allocation13], %s1085_s7  ;;  %s445_s9 = scalar_lea.vmem [#allocation11], %s1173_s5  ;;  %v311_v9 = vadd.f32 %v310_v52, %v307_v57 }
  0xad   :  { %v437_v58 = vld [vmem:[%s436_s4] sm:$0x1]  ;;  %v430_v60 = vadd.f32 %v429_v55, %v420_v45  ;;  %s1200_s15 = sld [smem:[#allocation7 + $0x24]]  ;;  %s452_s16 = scalar_lea.vmem [#allocation10], %s1177_s27 }
  0xae   :  { %v438_v61 = vmul.f32 %v437_v58, %v435_v56  ;;  %v444_v62 = vld [vmem:[%s443_s18] sm:$0x1]  ;;  %s1203_s29 = sld [smem:[#allocation2 + $0x25]]  ;;  %s454_s7 = scalar_lea.vmem [#allocation11], %s1183_s12  ;;  %v519_v22 = vrot.slane %v311_v9, 5 }
  0xaf   :  { %v360_v0 = vld [vmem:[%s359_s8] sm:$0x1]  ;;  %s1206_s0 = sld [smem:[#allocation7 + $0x25]]  ;;  %s409_s10 = scalar_lea.vmem [#allocation13], %s1139_s13 }
  0xb0   :  { %v446_v3 = vld [vmem:[%s445_s9] sm:$0x1]  ;;  %v439_v6 = vadd.f32 %v438_v61, %v430_v60  ;;  %s1209_s2 = sld [smem:[#allocation2 + $0x26]]  ;;  %s466_s3 = scalar_lea.vmem [#allocation10], %s1190_s23  ;;  %v361_v18 = vadd.f32 %v360_v0, %v357_v5  ;;  %v538_v35 = vsel %vm537_vm2, %v536_v25, %v519_v22 }
  0xb1   :  { %v447_v7 = vmul.f32 %v446_v3, %v444_v62  ;;  %v453_v8 = vld [vmem:[%s452_s16] sm:$0x1]  ;;  %s1212_s30 = sld [smem:[#allocation7 + $0x26]]  ;;  %s468_s5 = scalar_lea.vmem [#allocation11], %s1193_s19 }
  0xb2   :  { %v455_v10 = vld [vmem:[%s454_s7] sm:$0x1]  ;;  %s1215_s13 = sld [smem:[#allocation2 + $0x27]]  ;;  %s475_s25 = scalar_lea.vmem [#allocation10], %s1196_s28  ;;  %v522_v31 = vrot.slane %v361_v18, 4 }
  0xb3   :  { %v410_v11 = vld [vmem:[%s409_s10] sm:$0x1]  ;;  %v448_v12 = vadd.f32 %v447_v7, %v439_v6  ;;  %v456_v13 = vmul.f32 %v455_v10, %v453_v8  ;;  %s1218_s6 = sld [smem:[#allocation7 + $0x27]]  ;;  %s477_s27 = scalar_lea.vmem [#allocation11], %s1200_s15 }
  0xb4   :  { %v467_v16 = vld [vmem:[%s466_s3] sm:$0x1]  ;;  %s1221_s14 = sld [smem:[#allocation9 + $0x7]]  ;;  %v411_v26 = vadd.f32 %v410_v11, %v407_v15  ;;  %s459_s21 = scalar_lea.vmem [#allocation13], %s1186_s26  ;;  %v540_v43 = vsel %vm539_vm3, %v538_v35, %v522_v31 }
  0xb5   :  { %v469_v19 = vld [vmem:[%s468_s5] sm:$0x1]  ;;  %v457_v23 = vadd.f32 %v456_v13, %v448_v12  ;;  %s484_s22 = scalar_lea.vmem [#allocation10], %s1203_s29  ;;  %s486_s24 = scalar_lea.vmem [#allocation11], %s1206_s0 }
  0xb6   :  { %v470_v20 = vmul.f32 %v469_v19, %v467_v16  ;;  %v476_v21 = vld [vmem:[%s475_s25] sm:$0x1]  ;;  %s493_s11 = scalar_lea.vmem [#allocation10], %s1209_s2  ;;  %v525_v41 = vrot.slane %v411_v26, 3  ;;  %s1303_s4 = sld [smem:[#allocation49_spill]] }
  0xb7   :  { %v478_v24 = vld [vmem:[%s477_s27] sm:$0x1]  ;;  %s495_s12 = scalar_lea.vmem [#allocation11], %s1212_s30  ;;  %s908_s19 = smov [#allocation14]  }
  0xb8   :  { %v460_v27 = vld [vmem:[%s459_s21] sm:$0x1]  ;;  %v479_v28 = vmul.f32 %v478_v24, %v476_v21  ;;  %s502_s17 = scalar_lea.vmem [#allocation10], %s1215_s13  ;;  %v542_v49 = vsel %vm541_vm4, %v540_v43, %v525_v41  ;;  %s557_s18 = sshll.u32 %s908_s19, 4  ;;  %s558_s18 = int_to_ptr.vmem [resolvable:$true] %s557_s18 }
  0xb9   :  { %v485_v29 = vld [vmem:[%s484_s22] sm:$0x1]  ;;  %v461_v36 = vadd.f32 %v460_v27, %v457_v23  ;;  %s504_s26 = scalar_lea.vmem [#allocation11], %s1218_s6  ;;  %s1304_s9 = sld [smem:[#allocation50_spill]] }
  0xba   :  { %v487_v30 = vld [vmem:[%s486_s24] sm:$0x1]  ;;  %v480_v32 = vadd.f32 %v479_v28, %v470_v20  ;;  %s509_s20 = scalar_lea.vmem [#allocation13], %s1221_s14 }
  0xbb   :  { %v488_v33 = vmul.f32 %v487_v30, %v485_v29  ;;  %v494_v34 = vld [vmem:[%s493_s11] sm:$0x1]  ;;  %v528_v47 = vrot.slane %v461_v36, 2 }
  0xbc   :  { %v496_v37 = vld [vmem:[%s495_s12] sm:$0x1] }
  0xbd   :  { %v489_v38 = vadd.f32 %v488_v33, %v480_v32  ;;  %v497_v39 = vmul.f32 %v496_v37, %v494_v34  ;;  %v503_v40 = vld [vmem:[%s502_s17] sm:$0x1]  ;;  %v544_v51 = vsel %vm543_vm5, %v542_v49, %v528_v47 }
  0xbe   :  { %v505_v42 = vld [vmem:[%s504_s26] sm:$0x1] }
  0xbf   :  { %v498_v44 = vadd.f32 %v497_v39, %v489_v38  ;;  %v506_v45 = vmul.f32 %v505_v42, %v503_v40  ;;  %v510_v46 = vld [vmem:[%s509_s20] sm:$0x1]  ;;  %s559_s15 = sshll.u32 %s1304_s9, 4  ;;  %s560_s15 = int_to_ptr.hbm [resolvable:$true] %s559_s15 }
  0xc0   :  { %v755_v52 = vld [vmem:[%s1303_s4] ss:$0 sm:$0xff] }
  0xc1   :  { %v507_v48 = vadd.f32 %v506_v45, %v498_v44 }
  0xc3   :  { %v511_v50 = vadd.f32 %v510_v46, %v507_v48 }
  0xc5   :  { %v531_v53 = vrot.slane %v511_v50, 1 }
  0xc7   :  { %v546_v54 = vsel %vm545_vm6, %v544_v51, %v531_v53 }
  0xc8   :  { %v550_v55 = vadd.f32 %v755_v52, %v546_v54 }
  0xca   :  { %551 = vst [vmem:[#allocation14] sm:$0xff] %v550_v55 }
  0xcb   :  { %562 = dma.vmem_to_hbm [thread:$0]  %s558_s18, 128, %s560_s15, [#allocation4]  }
  0xcc   :  { %898 = dma.done.wait [#allocation4], 128  }
  0xcd   :  { %899 = vsyncadd [#allocation4], 4294967168 }
  0xce   :  { %567 = vsyncpa [#allocation3], 1 }
  0xcf   :  { %568 = vsyncpa [#allocation12], 1 }
  0xd0   :  { %569 = vsyncpa [#allocation4], 1 }
  0xd1   :  { %570 = vsyncpa [#allocation5], 1 }
  0xd2   :  { %571 = vsyncpa [#allocation8], 1 }
  0xd3   :  { %572 = vsyncpa [#allocation6], 1 }

</bundles_post_ra>
